<compile_context>
chip_gen: v7x
topology: tpu7x:2x2x1
jax: 0.10.0
libtpu: 0.0.40
codegen_flags: <defaults>
</compile_context>

<pallas_src>
import functools

import jax
import jax.numpy as jnp
from jax.experimental import pallas as pl
from jax.experimental.pallas import tpu as pltpu


# ----------------------------------------------------------------------------
# helpers
# ----------------------------------------------------------------------------
def _round_up(x, m):
    return (x + m - 1) // m * m


def _pick_tk(k):
    for t in (512, 256, 128):
        if k % t == 0:
            return t
    return k                      # full-dim K block (e.g. 147 for the 7x7 stem)


def _pick_tn(n):
    if n % 256 == 0:
        return 256
    if n % 128 == 0:
        return 128
    return n                      # full-dim lane block (e.g. 64 channels, fc=2)


def _pick_tm(m):
    return 512 if m >= 512 else _round_up(m, 8)


# ----------------------------------------------------------------------------
# fused (im2col/1x1) matmul + folded BN (+residual) (+ReLU)  kernels
# ----------------------------------------------------------------------------
def _mm_kernel(x_ref, w_ref, scale_ref, shift_ref, o_ref, acc_ref, *, relu):
    @pl.when(pl.program_id(2) == 0)
    def _():
        acc_ref[...] = jnp.zeros_like(acc_ref)

    acc_ref[...] += jnp.dot(x_ref[...], w_ref[...],
                            preferred_element_type=jnp.float32)

    @pl.when(pl.program_id(2) == pl.num_programs(2) - 1)
    def _():
        y = acc_ref[...] * scale_ref[...] + shift_ref[...]
        if relu:
            y = jnp.maximum(y, 0.0)
        o_ref[...] = y.astype(o_ref.dtype)


def _mm_res_kernel(x_ref, w_ref, scale_ref, shift_ref, res_ref, o_ref, acc_ref,
                   *, relu):
    @pl.when(pl.program_id(2) == 0)
    def _():
        acc_ref[...] = jnp.zeros_like(acc_ref)

    acc_ref[...] += jnp.dot(x_ref[...], w_ref[...],
                            preferred_element_type=jnp.float32)

    @pl.when(pl.program_id(2) == pl.num_programs(2) - 1)
    def _():
        y = (acc_ref[...] * scale_ref[...] + shift_ref[...]
             + res_ref[...].astype(jnp.float32))
        if relu:
            y = jnp.maximum(y, 0.0)
        o_ref[...] = y.astype(o_ref.dtype)


def fused_matmul(x, w, scale, shift, residual=None, relu=True,
                 out_dtype=jnp.bfloat16):
    """y = act((x @ w) * scale + shift (+ residual)) with a tiled (tm,tn,tk)
    grid, bf16 MXU inputs and an f32 VMEM accumulator."""
    m, k = x.shape
    k2, n = w.shape
    assert k == k2
    tm, tk, tn = _pick_tm(m), _pick_tk(k), _pick_tn(n)
    mp = _round_up(m, tm)

    x = x.astype(jnp.bfloat16)
    if mp != m:                                   # only the tiny fc path pads
        x = jnp.pad(x, ((0, mp - m), (0, 0)))
    w = w.astype(jnp.bfloat16)
    scale2 = scale.reshape(1, n).astype(jnp.float32)
    shift2 = shift.reshape(1, n).astype(jnp.float32)

    grid = (mp // tm, n // tn, k // tk)
    in_specs = [
        pl.BlockSpec((tm, tk), lambda i, j, kk: (i, kk)),
        pl.BlockSpec((tk, tn), lambda i, j, kk: (kk, j)),
        pl.BlockSpec((1, tn), lambda i, j, kk: (0, j)),
        pl.BlockSpec((1, tn), lambda i, j, kk: (0, j)),
    ]
    args = [x, w, scale2, shift2]
    if residual is None:
        kernel = functools.partial(_mm_kernel, relu=relu)
    else:
        r = residual.astype(jnp.bfloat16)
        if mp != m:
            r = jnp.pad(r, ((0, mp - m), (0, 0)))
        in_specs.append(pl.BlockSpec((tm, tn), lambda i, j, kk: (i, j)))
        args.append(r)
        kernel = functools.partial(_mm_res_kernel, relu=relu)

    out = pl.pallas_call(
        kernel,
        out_shape=jax.ShapeDtypeStruct((mp, n), out_dtype),
        grid=grid,
        in_specs=in_specs,
        out_specs=pl.BlockSpec((tm, tn), lambda i, j, kk: (i, j)),
        scratch_shapes=[pltpu.VMEM((tm, tn), jnp.float32)],
        compiler_params=pltpu.CompilerParams(
            dimension_semantics=("parallel", "parallel", "arbitrary")),
    )(*args)
    if mp != m:
        out = out[:m]
    return out


# ----------------------------------------------------------------------------
# direct 3x3 stride-1 conv kernel (no im2col): per-output-row blocks, the three
# vertical taps are three row views of the padded activation, the three
# horizontal taps are in-kernel slices.
# ----------------------------------------------------------------------------
def _conv3x3_kernel(x0_ref, x1_ref, x2_ref, w_ref, scale_ref, shift_ref, o_ref,
                    *, relu):
    wo = o_ref.shape[1]
    acc = None
    for di, xr_ref in enumerate((x0_ref, x1_ref, x2_ref)):
        xr = xr_ref[0]                              # (Wp, Cin) bf16
        for dj in range(3):
            part = jnp.dot(xr[dj:dj + wo, :], w_ref[di, dj],
                           preferred_element_type=jnp.float32)
            acc = part if acc is None else acc + part
    y = acc * scale_ref[...] + shift_ref[...]
    if relu:
        y = jnp.maximum(y, 0.0)
    o_ref[0] = y.astype(o_ref.dtype)


def conv3x3s1_bn(x, w_taps, scale, shift, relu=True):
    """3x3 conv, stride 1, pad 1 (NHWC), folded BN + ReLU.
    w_taps: (3, 3, Cin, Cout) bf16."""
    n, h, w, c = x.shape
    hp, wp = h + 2, w + 2
    ho, wo = h, w
    cout = w_taps.shape[-1]
    tn = _pick_tn(cout)

    xpad = jnp.pad(x.astype(jnp.bfloat16),
                   ((0, 0), (1, 1), (1, 1), (0, 0))).reshape(n * hp, wp, c)

    def x_map(di):
        return lambda j, m: ((m // ho) * hp + (m % ho) + di, 0, 0)

    out = pl.pallas_call(
        functools.partial(_conv3x3_kernel, relu=relu),
        out_shape=jax.ShapeDtypeStruct((n * ho, wo, cout), jnp.bfloat16),
        grid=(cout // tn, n * ho),                  # j outer -> weights resident
        in_specs=[
            pl.BlockSpec((1, wp, c), x_map(0)),
            pl.BlockSpec((1, wp, c), x_map(1)),
            pl.BlockSpec((1, wp, c), x_map(2)),
            pl.BlockSpec((3, 3, c, tn), lambda j, m: (0, 0, 0, j)),
            pl.BlockSpec((1, tn), lambda j, m: (0, j)),
            pl.BlockSpec((1, tn), lambda j, m: (0, j)),
        ],
        out_specs=pl.BlockSpec((1, wo, tn), lambda j, m: (m, 0, j)),
        compiler_params=pltpu.CompilerParams(
            dimension_semantics=("parallel", "parallel")),
    )(xpad, xpad, xpad, w_taps, scale, shift)
    return out.reshape(n, ho, wo, cout)


# ----------------------------------------------------------------------------
# 3x3 stride-2 max pool (stem): per-output-row kernel over the padded input.
# ----------------------------------------------------------------------------
def _maxpool_kernel(x0_ref, x1_ref, x2_ref, s_ref, o_ref):
    r = jnp.maximum(jnp.maximum(x0_ref[0], x1_ref[0]),
                    x2_ref[0]).astype(jnp.float32)       # (Wp, C)
    out = None
    for dj in range(3):
        sel = jnp.dot(s_ref[dj], r, preferred_element_type=jnp.float32)
        out = sel if out is None else jnp.maximum(out, sel)
    o_ref[0] = out.astype(o_ref.dtype)


def maxpool_3x3_s2(x):
    """3x3 max pool, stride 2, pad 1 (NHWC). Input is post-ReLU (>=0), so
    zero padding is equivalent to -inf padding."""
    n, h, w, c = x.shape
    hp, wp = h + 2, w + 2
    ho = (h + 2 - 3) // 2 + 1
    wo = (w + 2 - 3) // 2 + 1
    xpad = jnp.pad(x, ((0, 0), (1, 1), (1, 1), (0, 0))).reshape(n * hp, wp, c)

    # stride-2 column-selection matrices: S[dj, w, 2w+dj] = 1
    wcols = jnp.arange(wo)
    s_sel = jnp.zeros((3, wo, wp), jnp.float32)
    for dj in range(3):
        s_sel = s_sel.at[dj, wcols, 2 * wcols + dj].set(1.0)

    def x_map(di):
        return lambda m: ((m // ho) * hp + 2 * (m % ho) + di, 0, 0)

    out = pl.pallas_call(
        _maxpool_kernel,
        out_shape=jax.ShapeDtypeStruct((n * ho, wo, c), x.dtype),
        grid=(n * ho,),
        in_specs=[
            pl.BlockSpec((1, wp, c), x_map(0)),
            pl.BlockSpec((1, wp, c), x_map(1)),
            pl.BlockSpec((1, wp, c), x_map(2)),
            pl.BlockSpec((3, wo, wp), lambda m: (0, 0, 0)),
        ],
        out_specs=pl.BlockSpec((1, wo, c), lambda m: (m, 0, 0)),
        compiler_params=pltpu.CompilerParams(dimension_semantics=("parallel",)),
    )(xpad, xpad, xpad, s_sel)
    return out.reshape(n, ho, wo, c)


# ----------------------------------------------------------------------------
# global average pool (tiny, single block)
# ----------------------------------------------------------------------------
def _avgpool_kernel(x_ref, o_ref):
    o_ref[...] = jnp.mean(x_ref[...].astype(jnp.float32), axis=1)


def global_avgpool(x):
    n, h, w, c = x.shape
    xr = x.reshape(n, h * w, c)
    return pl.pallas_call(
        _avgpool_kernel,
        out_shape=jax.ShapeDtypeStruct((n, c), jnp.float32),
        grid=(1,),
        in_specs=[pl.BlockSpec((n, h * w, c), lambda i: (0, 0, 0))],
        out_specs=pl.BlockSpec((n, c), lambda i: (0, 0)),
    )(xr)


# ----------------------------------------------------------------------------
# conv wrappers
# ----------------------------------------------------------------------------
def conv1x1_bn(x, wm, scale, shift, stride=1, relu=True, residual=None):
    n = x.shape[0]
    if stride != 1:
        x = x[:, ::stride, ::stride, :]
    ho, wo = x.shape[1], x.shape[2]
    cin, cout = wm.shape
    cols = x.reshape(n * ho * wo, cin)
    res2d = None if residual is None else residual.reshape(n * ho * wo, cout)
    out = fused_matmul(cols, wm, scale, shift, residual=res2d, relu=relu)
    return out.reshape(n, ho, wo, cout)


def _im2col(x, kh, kw, stride, pad):
    n, h, w, c = x.shape
    xp = jnp.pad(x, ((0, 0), (pad, pad), (pad, pad), (0, 0)))
    ho = (h + 2 * pad - kh) // stride + 1
    wo = (w + 2 * pad - kw) // stride + 1
    cols = []
    for di in range(kh):
        for dj in range(kw):
            cols.append(xp[:, di:di + ho * stride:stride,
                           dj:dj + wo * stride:stride, :])
    patches = jnp.stack(cols, axis=3)                   # (N,Ho,Wo,kh*kw,C)
    return patches.reshape(n * ho * wo, kh * kw * c), ho, wo


def conv_im2col_bn(x, wm, scale, shift, kh, kw, stride, pad, relu=True):
    # used only for the 7x7 stem conv and the three stride-2 3x3 convs
    n = x.shape[0]
    cout = wm.shape[1]
    cols, ho, wo = _im2col(x.astype(jnp.bfloat16), kh, kw, stride, pad)
    out = fused_matmul(cols, wm, scale, shift, relu=relu)
    return out.reshape(n, ho, wo, cout)


# ----------------------------------------------------------------------------
# deterministic parameter construction (resnet101 shapes, fc -> 2 classes),
# packed directly into kernel-ready layouts (bf16 weights, folded BN in f32).
# ----------------------------------------------------------------------------
class _ParamGen:
    def __init__(self, key):
        self._key = key
        self._n = 0

    def next(self):
        self._n += 1
        return jax.random.fold_in(self._key, self._n)


def _conv_w(pg, cout, cin, kh, kw):
    fan_in = cin * kh * kw
    return jax.random.normal(pg.next(), (cout, cin, kh, kw),
                             jnp.float32) * jnp.sqrt(2.0 / fan_in)


def _fold_bn(pg, c, eps=1e-5):
    gamma = 1.0 + 0.1 * jax.random.normal(pg.next(), (c,), jnp.float32)
    beta = 0.1 * jax.random.normal(pg.next(), (c,), jnp.float32)
    mean = 0.1 * jax.random.normal(pg.next(), (c,), jnp.float32)
    var = 1.0 + 0.1 * jax.random.uniform(pg.next(), (c,), jnp.float32)
    scale = gamma / jnp.sqrt(var + eps)
    shift = beta - mean * scale
    return scale.reshape(1, c), shift.reshape(1, c)


def _pack_1x1(w):        # (Cout, Cin, 1, 1) -> (Cin, Cout) bf16
    return w[:, :, 0, 0].T.astype(jnp.bfloat16)


def _pack_im2col(w):     # (Cout, Cin, kh, kw) -> (kh*kw*Cin, Cout) bf16
    cout, cin, kh, kw = w.shape
    return jnp.transpose(w, (2, 3, 1, 0)).reshape(kh * kw * cin,
                                                  cout).astype(jnp.bfloat16)


def _pack_3x3(w):        # (Cout, Cin, 3, 3) -> (3, 3, Cin, Cout) bf16
    return jnp.transpose(w, (2, 3, 1, 0)).astype(jnp.bfloat16)


def _make_bottleneck(pg, inplanes, planes, stride, downsample):
    w1 = _conv_w(pg, planes, inplanes, 1, 1)
    bn1 = _fold_bn(pg, planes)
    w2 = _conv_w(pg, planes, planes, 3, 3)
    bn2 = _fold_bn(pg, planes)
    w3 = _conv_w(pg, planes * 4, planes, 1, 1)
    bn3 = _fold_bn(pg, planes * 4)
    p = {"conv1": _pack_1x1(w1), "bn1": bn1,
         "bn2": bn2,
         "conv3": _pack_1x1(w3), "bn3": bn3,
         "stride": stride}
    if stride == 1:
        p["conv2_taps"] = _pack_3x3(w2)
    else:
        p["conv2_cols"] = _pack_im2col(w2)
    if downsample:
        wd = _conv_w(pg, planes * 4, inplanes, 1, 1)
        p["dconv"] = _pack_1x1(wd)
        p["dbn"] = _fold_bn(pg, planes * 4)
    return p


def make_resnet101_params(key, num_classes=2):
    pg = _ParamGen(key)
    params = {
        "conv1": _pack_im2col(_conv_w(pg, 64, 3, 7, 7)),
        "bn1": _fold_bn(pg, 64),
    }
    cfg = [(64, 3, 1), (128, 4, 2), (256, 23, 2), (512, 3, 2)]  # resnet101
    inplanes = 64
    layers = []
    for planes, nblocks, stride in cfg:
        blocks = []
        for b in range(nblocks):
            s = stride if b == 0 else 1
            ds = b == 0 and (s != 1 or inplanes != planes * 4)
            blocks.append(_make_bottleneck(pg, inplanes, planes, s, ds))
            inplanes = planes * 4
        layers.append(blocks)
    params["layers"] = layers
    fc_w = jax.random.normal(pg.next(), (num_classes, 512 * 4),
                             jnp.float32) / jnp.sqrt(2048.0)
    fc_b = 0.01 * jax.random.normal(pg.next(), (num_classes,), jnp.float32)
    params["fc_w"] = fc_w.T.astype(jnp.bfloat16)          # (2048, num_classes)
    params["fc_scale"] = jnp.ones((1, num_classes), jnp.float32)
    params["fc_shift"] = fc_b.reshape(1, num_classes)
    return params


# ----------------------------------------------------------------------------
# forward pass
# ----------------------------------------------------------------------------
def _bottleneck_forward(x, p):
    if "dconv" in p:
        identity = conv1x1_bn(x, p["dconv"], *p["dbn"], stride=p["stride"],
                              relu=False)
    else:
        identity = x
    out = conv1x1_bn(x, p["conv1"], *p["bn1"], stride=1, relu=True)
    if p["stride"] == 1:
        out = conv3x3s1_bn(out, p["conv2_taps"], *p["bn2"], relu=True)
    else:
        out = conv_im2col_bn(out, p["conv2_cols"], *p["bn2"], kh=3, kw=3,
                             stride=p["stride"], pad=1, relu=True)
    # conv3 + bn3 + residual add + relu, fused in one Pallas kernel
    out = conv1x1_bn(out, p["conv3"], *p["bn3"], stride=1, relu=True,
                     residual=identity)
    return out


def resnet101_forward(params, x_nchw):
    x = jnp.transpose(x_nchw, (0, 2, 3, 1)).astype(jnp.bfloat16)  # NCHW->NHWC
    x = conv_im2col_bn(x, params["conv1"], *params["bn1"], kh=7, kw=7,
                       stride=2, pad=3, relu=True)
    x = maxpool_3x3_s2(x)
    for blocks in params["layers"]:
        for p in blocks:
            x = _bottleneck_forward(x, p)
    pooled = global_avgpool(x)                                   # (N, 2048) f32
    logits = fused_matmul(pooled, params["fc_w"], params["fc_scale"],
                          params["fc_shift"], relu=False,
                          out_dtype=jnp.float32)
    return logits


if __name__ == "__main__":
    key = jax.random.PRNGKey(0)
    params = make_resnet101_params(key, num_classes=2)
    # small spatial size (64x64) so every stage still has >=2x2 spatial extent
    x = jax.random.normal(jax.random.fold_in(key, 12345), (2, 3, 64, 64),
                          jnp.float32)
    out = resnet101_forward(params, x)
    out = jax.block_until_ready(out)
    assert out.shape == (2, 2), out.shape
    assert bool(jnp.all(jnp.isfinite(out)))
    print("KERNEL_OK")
</pallas_src>

<mosaic_0001>
module attributes {stable_mosaic.version = 11 : i64} {
  func.func @_mm_kernel(%arg0: i32, %arg1: i32, %arg2: i32, %arg3: memref<512x147xbf16, #tpu.memory_space<vmem>>, %arg4: memref<147x64xbf16, #tpu.memory_space<vmem>>, %arg5: memref<1x64xf32, #tpu.memory_space<vmem>>, %arg6: memref<1x64xf32, #tpu.memory_space<vmem>>, %arg7: memref<512x64xbf16, #tpu.memory_space<vmem>>, %arg8: memref<512x64xf32, #tpu.memory_space<vmem>>) attributes {dimension_semantics = [#tpu.dimension_semantics<parallel>, #tpu.dimension_semantics<parallel>, #tpu.dimension_semantics<arbitrary>], iteration_bounds = array<i64: 4, 1, 1>, scalar_prefetch = 0 : i64, scratch_operands = 1 : i64, tpu.core_type = #tpu.core_type<tc>, window_params = [{transform_indices = @transform_0, window_bounds = array<i64: 512, 147>}, {transform_indices = @transform_1, window_bounds = array<i64: 147, 64>}, {transform_indices = @transform_2, window_bounds = array<i64: 1, 64>}, {transform_indices = @transform_3, window_bounds = array<i64: 1, 64>}, {transform_indices = @transform_4, window_bounds = array<i64: 512, 64>}]} {
    %c0_i32 = arith.constant 0 : i32
    %0 = arith.cmpi eq, %arg2, %c0_i32 : i32
    %1 = arith.extui %0 : i1 to i32
    %c0_i32_0 = arith.constant 0 : i32
    %2 = arith.cmpi ne, %1, %c0_i32_0 : i32
    scf.if %2 {
      %cst_10 = arith.constant 0.000000e+00 : f32
      %12 = vector.broadcast %cst_10 : f32 to vector<512x64xf32>
      %c0_11 = arith.constant 0 : index
      %c0_12 = arith.constant 0 : index
      %13 = vector.load %arg8[%c0_11, %c0_12] : memref<512x64xf32, #tpu.memory_space<vmem>>, vector<512x64xf32>
      tpu.vector_store %arg8[%c0_11, %c0_12], %12 {strides = array<i32>} : memref<512x64xf32, #tpu.memory_space<vmem>>, vector<512x64xf32>,
    } else {
    }
    %c0 = arith.constant 0 : index
    %c0_1 = arith.constant 0 : index
    %3 = vector.load %arg8[%c0, %c0_1] : memref<512x64xf32, #tpu.memory_space<vmem>>, vector<512x64xf32>
    %c0_2 = arith.constant 0 : index
    %c0_3 = arith.constant 0 : index
    %4 = vector.load %arg3[%c0_2, %c0_3] : memref<512x147xbf16, #tpu.memory_space<vmem>>, vector<512x147xbf16>
    %c0_4 = arith.constant 0 : index
    %c0_5 = arith.constant 0 : index
    %5 = vector.load %arg4[%c0_4, %c0_5] : memref<147x64xbf16, #tpu.memory_space<vmem>>, vector<147x64xbf16>
    %cst = arith.constant dense<0.000000e+00> : vector<512x64xf32>
    %6 = tpu.matmul %4, %5, %cst {dimension_numbers = #tpu.dot_dimension_numbers<[1], [0], [0], [1], [0, 0, 1, 1], [], []>} : vector<512x147xbf16>, vector<147x64xbf16>, vector<512x64xf32> -> vector<512x64xf32>
    %7 = arith.addf %3, %6 : vector<512x64xf32>
    %c0_6 = arith.constant 0 : index
    %c0_7 = arith.constant 0 : index
    %8 = vector.load %arg8[%c0_6, %c0_7] : memref<512x64xf32, #tpu.memory_space<vmem>>, vector<512x64xf32>
    tpu.vector_store %arg8[%c0_6, %c0_7], %7 {strides = array<i32>} : memref<512x64xf32, #tpu.memory_space<vmem>>, vector<512x64xf32>,
    %c0_i32_8 = arith.constant 0 : i32
    %9 = arith.cmpi eq, %arg2, %c0_i32_8 : i32
    %10 = arith.extui %9 : i1 to i32
    %c0_i32_9 = arith.constant 0 : i32
    %11 = arith.cmpi ne, %10, %c0_i32_9 : i32
    scf.if %11 {
      %c0_10 = arith.constant 0 : index
      %c0_11 = arith.constant 0 : index
      %12 = vector.load %arg8[%c0_10, %c0_11] : memref<512x64xf32, #tpu.memory_space<vmem>>, vector<512x64xf32>
      %c0_12 = arith.constant 0 : index
      %c0_13 = arith.constant 0 : index
      %13 = vector.load %arg5[%c0_12, %c0_13] : memref<1x64xf32, #tpu.memory_space<vmem>>, vector<1x64xf32>
      %14 = vector.broadcast %13 : vector<1x64xf32> to vector<512x64xf32>
      %15 = arith.mulf %12, %14 : vector<512x64xf32>
      %c0_14 = arith.constant 0 : index
      %c0_15 = arith.constant 0 : index
      %16 = vector.load %arg6[%c0_14, %c0_15] : memref<1x64xf32, #tpu.memory_space<vmem>>, vector<1x64xf32>
      %17 = vector.broadcast %16 : vector<1x64xf32> to vector<512x64xf32>
      %18 = arith.addf %15, %17 : vector<512x64xf32>
      %cst_16 = arith.constant 0.000000e+00 : f32
      %19 = vector.broadcast %cst_16 : f32 to vector<512x64xf32>
      %20 = arith.maximumf %18, %19 : vector<512x64xf32>
      %21 = arith.truncf %20 : vector<512x64xf32> to vector<512x64xbf16>
      %c0_17 = arith.constant 0 : index
      %c0_18 = arith.constant 0 : index
      %22 = vector.load %arg7[%c0_17, %c0_18] : memref<512x64xbf16, #tpu.memory_space<vmem>>, vector<512x64xbf16>
      tpu.vector_store %arg7[%c0_17, %c0_18], %21 {strides = array<i32>} : memref<512x64xbf16, #tpu.memory_space<vmem>>, vector<512x64xbf16>,
    } else {
    }
    return
  }
  func.func @transform_0(%arg0: i32, %arg1: i32, %arg2: i32) -> (i32, i32) {
    %c0_i32 = arith.constant 0 : i32
    return %arg0, %arg2 : i32, i32
  }
  func.func @transform_1(%arg0: i32, %arg1: i32, %arg2: i32) -> (i32, i32) {
    %c0_i32 = arith.constant 0 : i32
    return %arg2, %arg1 : i32, i32
  }
  func.func @transform_2(%arg0: i32, %arg1: i32, %arg2: i32) -> (i32, i32) {
    %c0_i32 = arith.constant 0 : i32
    %c0_i32_0 = arith.constant 0 : i32
    return %c0_i32, %arg1 : i32, i32
  }
  func.func @transform_3(%arg0: i32, %arg1: i32, %arg2: i32) -> (i32, i32) {
    %c0_i32 = arith.constant 0 : i32
    %c0_i32_0 = arith.constant 0 : i32
    return %c0_i32, %arg1 : i32, i32
  }
  func.func @transform_4(%arg0: i32, %arg1: i32, %arg2: i32) -> (i32, i32) {
    %c0_i32 = arith.constant 0 : i32
    return %arg0, %arg1 : i32, i32
  }
}

</mosaic_0001>

<bundles_post_ra>
// kernel: tpu_custom_call.1
= control target key start
LH: loop header
LB: loop body
LE: loop exit
PB: predicated region body
PF: predicated region fallthrough
CT: control target
= control target key end

     0   :  { %s2571_s15 = smov 0   ;;  %s2573_s16 = smov 0   ;;  %s3230_s0 = inlined_call_operand.vmem [shape: bf16[2048,147], index: 0, kind: input, shape index: {}]   ;;  %s3231_s1 = inlined_call_operand.vmem [shape: bf16[147,64], index: 1, kind: input, shape index: {}]   ;;  %s3232_s2 = inlined_call_operand.vmem [shape: f32[1,64], index: 2, kind: input, shape index: {}]   ;;  %s3233_s3 = inlined_call_operand.vmem [shape: f32[1,64], index: 3, kind: input, shape index: {}]   ;;  %s3234_s4 = inlined_call_operand.vmem [shape: bf16[2048,64], index: 4, kind: output, shape index: {}]  }
   0x1   :  { %s2575_s17 = smov 0  }
   0x2 LB: > { %s33_s18 = sadd.s32 1, %s2537_s16  ;;  %p2119_p0 = scmp.ge.s32.totalorder %s2541_s17, 1  ;;  %s2541_s17 = sphi %s2575_s17, %s14_s17   ;;  %s2537_s16 = sphi %s2573_s16, %s3236_s16   ;;  %s2533_s15 = sphi %s2571_s15, %s3235_s15  }
   0x3   : > { %p35_p1 = scmp.ge.s32.totalorder %s33_s18, 4  ;;  %p224_p2 = scmp.lt.s32.totalorder %s2541_s17, 5 }
   0x5   : > { %s3238_s18 = smov (%p35_p1, %s33_s18), 0  ;;  %p225_p3 = pnand %p2119_p0, %p224_p2 }
   0x6   : > { %v2411_v0 = vld [vmem:[%s3231_s1] sm:$0xff] (!%p225_p3)   ;;  %v2543_v1 = vmov (!%p225_p3), 0   ;;  %v2412_v2 = vld [vmem:[%s3231_s1 + $0x8] sm:$0xff] (!%p225_p3)   ;;  %v2413_v3 = vld [vmem:[%s3231_s1 + $0x10] sm:$0xff] (!%p225_p3)   ;;  %s2120_s25 = sshll.u32 (!%p225_p3), %s2533_s15, 6  ;;  %vm870_vm0 = vcmask (!%p225_p3), 154624  }
   0x7   : > { %228 = sbr.rel (%p225_p3) target bundleno = 403 (0x193), region = 36  ;;  %974 = vmatprep.subr.bf16.mxu0 (!%p225_p3), %v2543_v1  ;;  %2364 = vmatprep.subr.bf16.mxu1 (!%p225_p3), %v2543_v1  ;;  %p274_p4 = scmp.lt.s32.totalorder (!%p225_p3), %s2120_s25, 255  ;;  %v2414_v4 = vld [vmem:[%s3231_s1 + $0x18] sm:$0xff] (!%p225_p3)   ;;  %v2415_v5 = vld [vmem:[%s3231_s1 + $0x20] sm:$0xff] (!%p225_p3)   ;;  %v2416_v8 = vld [vmem:[%s3231_s1 + $0x28] sm:$0xff] (!%p225_p3)   ;;  %vm967_vm1 = vcmask (!%p225_p3), 1040384  }
   0x8   : > { %975 = vmatpush1.bf16.msra.mxu0 (!%p225_p3), %v2411_v0  ;;  %2374 = vmatpush1.bf16.msra.mxu1 (!%p225_p3), %v2411_v0  ;;  %v2417_v9 = vld [vmem:[%s3231_s1 + $0x30] sm:$0xff] (!%p225_p3)   ;;  %v2418_v10 = vld [vmem:[%s3231_s1 + $0x38] sm:$0xff] (!%p225_p3)   ;;  %vm968_vm2 = vcmask (!%p225_p3), 1041408   ;;  %v2544_v11 = vmov (!%p225_p3), 65535   ;;  %v2419_v13 = vld [vmem:[%s3231_s1 + $0x40] sm:$0xff] (!%p225_p3)   ;;  %vm313_vm3 = vcmask (!%p225_p3), 523264  }
   0x9   : > { %976 = vmatprep.subr.bf16.mxu0 (!%p225_p3), %v2543_v1  ;;  %2365 = vmatprep.subr.bf16.mxu1 (!%p225_p3), %v2543_v1  ;;  %v969_v12 = vsel (!%p225_p3), %vm967_vm1, 4294967295, %v2544_v11  ;;  %v2420_v14 = vld [vmem:[%s3231_s1 + $0x48] ss:$0 sps:$4 sm:$0x33] (!%p225_p3)   ;;  %v2545_v17 = vmov (!%p225_p3), 0.0   ;;  %vm1921_vm4 = vcmask (!%p225_p3), 519168  }
   0xa   : > { %v970_v15 = vsel (!%p225_p3), %vm968_vm2, %v969_v12, 0  ;;  %314 = vst.msk [vmem:[#allocation2] sm:$0xff] (!%p225_p3), %vm313_vm3, %v2545_v17  ;;  %315 = vst.msk [vmem:[#allocation2 + $0x8] sm:$0xff] (!%p225_p3), %vm313_vm3, %v2545_v17 }
   0xb   : > { %v2649_v16 = vand.u32 (!%p225_p3), %v2420_v14, %v970_v15  ;;  %316 = vst.msk [vmem:[#allocation2 + $0x10] sm:$0xff] (!%p225_p3), %vm313_vm3, %v2545_v17  ;;  %317 = vst.msk [vmem:[#allocation2 + $0x18] sm:$0xff] (!%p225_p3), %vm313_vm3, %v2545_v17 }
   0xc   : > { %977 = vmatpush1.bf16.msra.mxu0 (!%p225_p3), %v2412_v2  ;;  %2375 = vmatpush1.bf16.msra.mxu1 (!%p225_p3), %v2412_v2  ;;  %318 = vst.msk [vmem:[#allocation2 + $0x20] sm:$0xff] (!%p225_p3), %vm313_vm3, %v2545_v17  ;;  %319 = vst.msk [vmem:[#allocation2 + $0x28] sm:$0xff] (!%p225_p3), %vm313_vm3, %v2545_v17 }
   0xd   : > { %978 = vmatprep.subr.bf16.mxu0 (!%p225_p3), %v2543_v1  ;;  %2366 = vmatprep.subr.bf16.mxu1 (!%p225_p3), %v2543_v1  ;;  %320 = vst.msk [vmem:[#allocation2 + $0x30] sm:$0xff] (!%p225_p3), %vm313_vm3, %v2545_v17  ;;  %321 = vst.msk [vmem:[#allocation2 + $0x38] sm:$0xff] (!%p225_p3), %vm313_vm3, %v2545_v17 }
   0xe   : > { %s3240_s25 = smov (!%p274_p4, %s2120_s25), 255  ;;  %322 = vst.msk [vmem:[#allocation2 + $0x40] sm:$0xff] %vm313_vm3, %v2545_v17  ;;  %323 = vst.msk [vmem:[#allocation2 + $0x48] sm:$0xff] %vm313_vm3, %v2545_v17 }
   0xf   : > { %s2299_s28 = sshll.u32 %s3240_s25, 3  ;;  %324 = vst.msk [vmem:[#allocation2 + $0x50] sm:$0xff] %vm313_vm3, %v2545_v17  ;;  %325 = vst.msk [vmem:[#allocation2 + $0x58] sm:$0xff] %vm313_vm3, %v2545_v17  ;;  %s2124_s26 = sshll.u32 %s3240_s25, 2 }
  0x10   : > { %979 = vmatpush1.bf16.msra.mxu0 %v2413_v3  ;;  %2376 = vmatpush1.bf16.msra.mxu1 %v2413_v3  ;;  %s2615_s5 = scalar_lea.vmem %s3230_s0, %s2299_s28  ;;  %326 = vst.msk [vmem:[#allocation2 + $0x60] sm:$0xff] %vm313_vm3, %v2545_v17  ;;  %327 = vst.msk [vmem:[#allocation2 + $0x68] sm:$0xff] %vm313_vm3, %v2545_v17  ;;  %s2905_s28 = scalar_lea.vmem %s3234_s4, %s2124_s26 }
  0x11   : > { %980 = vmatprep.subr.bf16.mxu0 %v2543_v1  ;;  %2367 = vmatprep.subr.bf16.mxu1 %v2543_v1  ;;  %v2423_v6 = vld [vmem:[%s2615_s5 + $0x4] ss:$8 sps:$4 sm:$0xff]   ;;  %328 = vst.msk [vmem:[#allocation2 + $0x70] sm:$0xff] %vm313_vm3, %v2545_v17  ;;  %329 = vst.msk [vmem:[#allocation2 + $0x78] sm:$0xff] %vm313_vm3, %v2545_v17  ;;  %v2421_v18 = vld [vmem:[%s2615_s5] ss:$8 sps:$4 sm:$0xff]  }
  0x12   : > { %v2426_v7 = vld [vmem:[%s2615_s5 + $0x104] ss:$8 sps:$4 sm:$0xff]   ;;  %2199 = vmatprep.mubr.msk.bf16.mxu0 %vm870_vm0, %v2423_v6  ;;  %330 = vst.msk [vmem:[#allocation2 + $0x80] sm:$0xff] %vm313_vm3, %v2545_v17  ;;  %331 = vst.msk [vmem:[#allocation2 + $0x88] sm:$0xff] %vm313_vm3, %v2545_v17  ;;  %v2424_v19 = vld [vmem:[%s2615_s5 + $0x100] ss:$8 sps:$4 sm:$0xff]  }
  0x13   : > { %2215 = vmatprep.mubr.msk.bf16.mxu1 %vm870_vm0, %v2426_v7  ;;  %332 = vst.msk [vmem:[#allocation2 + $0x90] sm:$0xff] %vm313_vm3, %v2545_v17  ;;  %333 = vst.msk [vmem:[#allocation2 + $0x98] sm:$0xff] %vm313_vm3, %v2545_v17  ;;  %v2427_v20 = vld [vmem:[%s2615_s5 + $0x14] ss:$8 sps:$4 sm:$0xff]   ;;  %v2431_v22 = vld [vmem:[%s2615_s5 + $0x10] ss:$8 sps:$4 sm:$0xff]  }
  0x14   : > { %981 = vmatpush1.bf16.msra.mxu0 %v2414_v4  ;;  %2377 = vmatpush1.bf16.msra.mxu1 %v2414_v4  ;;  %334 = vst.msk [vmem:[#allocation2 + $0xa0] sm:$0xff] %vm313_vm3, %v2545_v17  ;;  %335 = vst.msk [vmem:[#allocation2 + $0xa8] sm:$0xff] %vm313_vm3, %v2545_v17  ;;  %v2429_v21 = vld [vmem:[%s2615_s5 + $0x114] ss:$8 sps:$4 sm:$0xff]   ;;  %v2432_v23 = vld [vmem:[%s2615_s5 + $0x110] ss:$8 sps:$4 sm:$0xff]  }
  0x15   : > { %982 = vmatprep.subr.bf16.mxu0 %v2543_v1  ;;  %2368 = vmatprep.subr.bf16.mxu1 %v2543_v1  ;;  %336 = vst.msk [vmem:[#allocation2 + $0xb0] sm:$0xff] %vm313_vm3, %v2545_v17  ;;  %337 = vst.msk [vmem:[#allocation2 + $0xb8] sm:$0xff] %vm313_vm3, %v2545_v17  ;;  %v2433_v24 = vld [vmem:[%s2615_s5 + $0x24] ss:$8 sps:$4 sm:$0xff]   ;;  %v2437_v26 = vld [vmem:[%s2615_s5 + $0x20] ss:$8 sps:$4 sm:$0xff]  }
  0x16   : > { %338 = vst.msk [vmem:[#allocation2 + $0xc0] sm:$0xff] %vm313_vm3, %v2545_v17  ;;  %339 = vst.msk [vmem:[#allocation2 + $0xc8] sm:$0xff] %vm313_vm3, %v2545_v17  ;;  %v2435_v25 = vld [vmem:[%s2615_s5 + $0x124] ss:$8 sps:$4 sm:$0xff]   ;;  %v2438_v27 = vld [vmem:[%s2615_s5 + $0x120] ss:$8 sps:$4 sm:$0xff]  }
  0x17   : > { %340 = vst.msk [vmem:[#allocation2 + $0xd0] sm:$0xff] %vm313_vm3, %v2545_v17  ;;  %341 = vst.msk [vmem:[#allocation2 + $0xd8] sm:$0xff] %vm313_vm3, %v2545_v17  ;;  %v2439_v28 = vld [vmem:[%s2615_s5 + $0x34] ss:$8 sps:$4 sm:$0xff]   ;;  %v2443_v30 = vld [vmem:[%s2615_s5 + $0x30] ss:$8 sps:$4 sm:$0xff]  }
  0x18   : > { %983 = vmatpush1.bf16.msra.mxu0 %v2415_v5  ;;  %2378 = vmatpush1.bf16.msra.mxu1 %v2415_v5  ;;  %342 = vst.msk [vmem:[#allocation2 + $0xe0] sm:$0xff] %vm313_vm3, %v2545_v17  ;;  %343 = vst.msk [vmem:[#allocation2 + $0xe8] sm:$0xff] %vm313_vm3, %v2545_v17  ;;  %v2441_v29 = vld [vmem:[%s2615_s5 + $0x134] ss:$8 sps:$4 sm:$0xff]   ;;  %v2444_v31 = vld [vmem:[%s2615_s5 + $0x130] ss:$8 sps:$4 sm:$0xff]  }
  0x19   : > { %984 = vmatprep.subr.bf16.mxu0 %v2543_v1  ;;  %2369 = vmatprep.subr.bf16.mxu1 %v2543_v1  ;;  %344 = vst.msk [vmem:[#allocation2 + $0xf0] sm:$0xff] %vm313_vm3, %v2545_v17  ;;  %345 = vst.msk [vmem:[#allocation2 + $0xf8] sm:$0xff] %vm313_vm3, %v2545_v17  ;;  %v2445_v32 = vld [vmem:[%s2615_s5 + $0x44] ss:$8 sps:$4 sm:$0xff]   ;;  %v2449_v34 = vld [vmem:[%s2615_s5 + $0x40] ss:$8 sps:$4 sm:$0xff]  }
  0x1a   : > { %346 = vst.msk [vmem:[#allocation2 + $0x100] sm:$0xff] %vm313_vm3, %v2545_v17  ;;  %347 = vst.msk [vmem:[#allocation2 + $0x108] sm:$0xff] %vm313_vm3, %v2545_v17  ;;  %v2447_v33 = vld [vmem:[%s2615_s5 + $0x144] ss:$8 sps:$4 sm:$0xff]   ;;  %v2450_v35 = vld [vmem:[%s2615_s5 + $0x140] ss:$8 sps:$4 sm:$0xff]  }
  0x1b   : > { %348 = vst.msk [vmem:[#allocation2 + $0x110] sm:$0xff] %vm313_vm3, %v2545_v17  ;;  %349 = vst.msk [vmem:[#allocation2 + $0x118] sm:$0xff] %vm313_vm3, %v2545_v17  ;;  %v2451_v36 = vld [vmem:[%s2615_s5 + $0x54] ss:$8 sps:$4 sm:$0xff]   ;;  %v2455_v38 = vld [vmem:[%s2615_s5 + $0x50] ss:$8 sps:$4 sm:$0xff]  }
  0x1c   : > { %985 = vmatpush1.bf16.msra.mxu0 %v2416_v8  ;;  %2379 = vmatpush1.bf16.msra.mxu1 %v2416_v8  ;;  %350 = vst.msk [vmem:[#allocation2 + $0x120] sm:$0xff] %vm313_vm3, %v2545_v17  ;;  %351 = vst.msk [vmem:[#allocation2 + $0x128] sm:$0xff] %vm313_vm3, %v2545_v17  ;;  %v2453_v37 = vld [vmem:[%s2615_s5 + $0x154] ss:$8 sps:$4 sm:$0xff]   ;;  %v2456_v39 = vld [vmem:[%s2615_s5 + $0x150] ss:$8 sps:$4 sm:$0xff]  }
  0x1d   : > { %986 = vmatprep.subr.bf16.mxu0 %v2543_v1  ;;  %2370 = vmatprep.subr.bf16.mxu1 %v2543_v1  ;;  %352 = vst.msk [vmem:[#allocation2 + $0x130] sm:$0xff] %vm313_vm3, %v2545_v17  ;;  %353 = vst.msk [vmem:[#allocation2 + $0x138] sm:$0xff] %vm313_vm3, %v2545_v17  ;;  %v2457_v40 = vld [vmem:[%s2615_s5 + $0x64] ss:$8 sps:$4 sm:$0xff]   ;;  %v2461_v42 = vld [vmem:[%s2615_s5 + $0x60] ss:$8 sps:$4 sm:$0xff]  }
  0x1e   : > { %354 = vst.msk [vmem:[#allocation2 + $0x140] sm:$0xff] %vm313_vm3, %v2545_v17  ;;  %355 = vst.msk [vmem:[#allocation2 + $0x148] sm:$0xff] %vm313_vm3, %v2545_v17  ;;  %v2459_v41 = vld [vmem:[%s2615_s5 + $0x164] ss:$8 sps:$4 sm:$0xff]   ;;  %v2462_v43 = vld [vmem:[%s2615_s5 + $0x160] ss:$8 sps:$4 sm:$0xff]  }
  0x1f   : > { %356 = vst.msk [vmem:[#allocation2 + $0x150] sm:$0xff] %vm313_vm3, %v2545_v17  ;;  %357 = vst.msk [vmem:[#allocation2 + $0x158] sm:$0xff] %vm313_vm3, %v2545_v17  ;;  %v2463_v44 = vld [vmem:[%s2615_s5 + $0x74] ss:$8 sps:$4 sm:$0xff]   ;;  %v2467_v46 = vld [vmem:[%s2615_s5 + $0x70] ss:$8 sps:$4 sm:$0xff]  }
  0x20   : > { %987 = vmatpush1.bf16.msra.mxu0 %v2417_v9  ;;  %2380 = vmatpush1.bf16.msra.mxu1 %v2417_v9  ;;  %358 = vst.msk [vmem:[#allocation2 + $0x160] sm:$0xff] %vm313_vm3, %v2545_v17  ;;  %359 = vst.msk [vmem:[#allocation2 + $0x168] sm:$0xff] %vm313_vm3, %v2545_v17  ;;  %v2465_v45 = vld [vmem:[%s2615_s5 + $0x174] ss:$8 sps:$4 sm:$0xff]   ;;  %v2468_v47 = vld [vmem:[%s2615_s5 + $0x170] ss:$8 sps:$4 sm:$0xff]  }
  0x21   : > { %988 = vmatprep.subr.bf16.mxu0 %v2543_v1  ;;  %2371 = vmatprep.subr.bf16.mxu1 %v2543_v1  ;;  %360 = vst.msk [vmem:[#allocation2 + $0x170] sm:$0xff] %vm313_vm3, %v2545_v17  ;;  %361 = vst.msk [vmem:[#allocation2 + $0x178] sm:$0xff] %vm313_vm3, %v2545_v17  ;;  %v2469_v48 = vld [vmem:[%s2615_s5 + $0x84] ss:$8 sps:$4 sm:$0xff]   ;;  %v2473_v50 = vld [vmem:[%s2615_s5 + $0x80] ss:$8 sps:$4 sm:$0xff]  }
  0x22   : > { %362 = vst.msk [vmem:[#allocation2 + $0x180] sm:$0xff] %vm313_vm3, %v2545_v17  ;;  %363 = vst.msk [vmem:[#allocation2 + $0x188] sm:$0xff] %vm313_vm3, %v2545_v17  ;;  %v2471_v49 = vld [vmem:[%s2615_s5 + $0x184] ss:$8 sps:$4 sm:$0xff]   ;;  %v2474_v51 = vld [vmem:[%s2615_s5 + $0x180] ss:$8 sps:$4 sm:$0xff]  }
  0x23   : > { %364 = vst.msk [vmem:[#allocation2 + $0x190] sm:$0xff] %vm313_vm3, %v2545_v17  ;;  %365 = vst.msk [vmem:[#allocation2 + $0x198] sm:$0xff] %vm313_vm3, %v2545_v17  ;;  %v2475_v52 = vld [vmem:[%s2615_s5 + $0x94] ss:$8 sps:$4 sm:$0xff]   ;;  %v2479_v54 = vld [vmem:[%s2615_s5 + $0x90] ss:$8 sps:$4 sm:$0xff]  }
  0x24   : > { %989 = vmatpush1.bf16.msra.mxu0 %v2418_v10  ;;  %2381 = vmatpush1.bf16.msra.mxu1 %v2418_v10  ;;  %366 = vst.msk [vmem:[#allocation2 + $0x1a0] sm:$0xff] %vm313_vm3, %v2545_v17  ;;  %367 = vst.msk [vmem:[#allocation2 + $0x1a8] sm:$0xff] %vm313_vm3, %v2545_v17  ;;  %v2477_v53 = vld [vmem:[%s2615_s5 + $0x194] ss:$8 sps:$4 sm:$0xff]   ;;  %v2480_v55 = vld [vmem:[%s2615_s5 + $0x190] ss:$8 sps:$4 sm:$0xff]  }
  0x25   : > { %990 = vmatprep.subr.bf16.mxu0 %v2543_v1  ;;  %2372 = vmatprep.subr.bf16.mxu1 %v2543_v1  ;;  %368 = vst.msk [vmem:[#allocation2 + $0x1b0] sm:$0xff] %vm313_vm3, %v2545_v17  ;;  %369 = vst.msk [vmem:[#allocation2 + $0x1b8] sm:$0xff] %vm313_vm3, %v2545_v17  ;;  %v2481_v56 = vld [vmem:[%s2615_s5 + $0xa4] ss:$8 sps:$4 sm:$0xff]   ;;  %v2485_v58 = vld [vmem:[%s2615_s5 + $0xa0] ss:$8 sps:$4 sm:$0xff]  }
  0x26   : > { %370 = vst.msk [vmem:[#allocation2 + $0x1c0] sm:$0xff] %vm313_vm3, %v2545_v17  ;;  %371 = vst.msk [vmem:[#allocation2 + $0x1c8] sm:$0xff] %vm313_vm3, %v2545_v17  ;;  %v2483_v57 = vld [vmem:[%s2615_s5 + $0x1a4] ss:$8 sps:$4 sm:$0xff]   ;;  %v2486_v59 = vld [vmem:[%s2615_s5 + $0x1a0] ss:$8 sps:$4 sm:$0xff]  }
  0x27   : > { %372 = vst.msk [vmem:[#allocation2 + $0x1d0] sm:$0xff] %vm313_vm3, %v2545_v17  ;;  %373 = vst.msk [vmem:[#allocation2 + $0x1d8] sm:$0xff] %vm313_vm3, %v2545_v17  ;;  %v2487_v60 = vld [vmem:[%s2615_s5 + $0xb4] ss:$8 sps:$4 sm:$0xff]   ;;  %v2491_v62 = vld [vmem:[%s2615_s5 + $0xb0] ss:$8 sps:$4 sm:$0xff]  }
  0x28   : > { %991 = vmatpush1.bf16.msra.mxu0 %v2419_v13  ;;  %2382 = vmatpush1.bf16.msra.mxu1 %v2419_v13  ;;  %374 = vst.msk [vmem:[#allocation2 + $0x1e0] sm:$0xff] %vm313_vm3, %v2545_v17  ;;  %375 = vst.msk [vmem:[#allocation2 + $0x1e8] sm:$0xff] %vm313_vm3, %v2545_v17  ;;  %v2489_v61 = vld [vmem:[%s2615_s5 + $0x1b4] ss:$8 sps:$4 sm:$0xff]   ;;  %v2492_v63 = vld [vmem:[%s2615_s5 + $0x1b0] ss:$8 sps:$4 sm:$0xff]  }
  0x29   : > { %992 = vmatprep.subr.bf16.mxu0 %v2543_v1  ;;  %2373 = vmatprep.subr.bf16.mxu1 %v2543_v1  ;;  %376 = vst.msk [vmem:[#allocation2 + $0x1f0] sm:$0xff] %vm313_vm3, %v2545_v17  ;;  %377 = vst.msk [vmem:[#allocation2 + $0x1f8] sm:$0xff] %vm313_vm3, %v2545_v17  ;;  %v2493_v0 = vld [vmem:[%s2615_s5 + $0xc4] ss:$8 sps:$4 sm:$0xff]   ;;  %v2497_v2 = vld [vmem:[%s2615_s5 + $0xc0] ss:$8 sps:$4 sm:$0xff]  }
  0x2a   : > { %v2495_v1 = vld [vmem:[%s2615_s5 + $0x1c4] ss:$8 sps:$4 sm:$0xff]   ;;  %v2498_v3 = vld [vmem:[%s2615_s5 + $0x1c0] ss:$8 sps:$4 sm:$0xff]   ;;  %v2499_v4 = vld [vmem:[%s2615_s5 + $0xd4] ss:$8 sps:$4 sm:$0xff]  }
  0x2b   : > { %v2501_v5 = vld [vmem:[%s2615_s5 + $0x1d4] ss:$8 sps:$4 sm:$0xff]   ;;  %v2503_v6 = vld [vmem:[%s2615_s5 + $0xd0] ss:$8 sps:$4 sm:$0xff]   ;;  %v2505_v8 = vld [vmem:[%s2615_s5 + $0xe4] ss:$8 sps:$4 sm:$0xff]  }
  0x2c   : > { %993 = vmatpush1.bf16.msra.mxu0 %v2649_v16  ;;  %2383 = vmatpush1.bf16.msra.mxu1 %v2649_v16  ;;  %v2504_v7 = vld [vmem:[%s2615_s5 + $0x1d0] ss:$8 sps:$4 sm:$0xff]   ;;  %v2507_v9 = vld [vmem:[%s2615_s5 + $0x1e4] ss:$8 sps:$4 sm:$0xff]   ;;  %v2509_v10 = vld [vmem:[%s2615_s5 + $0xe0] ss:$8 sps:$4 sm:$0xff]  }
  0x2d   : > { %v2510_v11 = vld [vmem:[%s2615_s5 + $0x1e0] ss:$8 sps:$4 sm:$0xff]   ;;  %v2511_v12 = vld [vmem:[%s2615_s5 + $0xf4] ss:$8 sps:$4 sm:$0xff]   ;;  %v2515_v14 = vld [vmem:[%s2615_s5 + $0xf0] ss:$8 sps:$4 sm:$0xff]  }
  0x2e   : > { %v2513_v13 = vld [vmem:[%s2615_s5 + $0x1f4] ss:$8 sps:$4 sm:$0xff]   ;;  %v2516_v15 = vld [vmem:[%s2615_s5 + $0x1f0] ss:$8 sps:$4 sm:$0xff]   ;;  %v378_v16 = vld [vmem:[#allocation2] sm:$0xff] }
  0x2f   : > { %1007 = vmatmul.mubr.bf16.vlgmr.msra.gmra.mrb[0].mxu0 %v2421_v18  ;;  %1135 = vmatmul.mubr.bf16.vlgmr.msra.gmra.mrb[0].mxu1 %v2424_v19  ;;  %v410_v17 = vld [vmem:[#allocation2 + $0x100] sm:$0xff] }
  0x30   : > { %2200 = vmatprep.mubr.msk.bf16.mxu0 %vm870_vm0, %v2427_v20  ;;  %2216 = vmatprep.mubr.msk.bf16.mxu1 %vm870_vm0, %v2429_v21  ;;  %v379_v20 = vld [vmem:[#allocation2 + $0x8] sm:$0xff] }
  0x31   : > { %v411_v21 = vld [vmem:[#allocation2 + $0x108] sm:$0xff] }
  0x37   : > { %1015 = vmatmul.mubr.bf16.gmra.mrb[4].mxu0 %v2431_v22  ;;  %1143 = vmatmul.mubr.bf16.gmra.mrb[4].mxu1 %v2432_v23 }
  0x38   : > { %2201 = vmatprep.mubr.msk.bf16.mxu0 %vm870_vm0, %v2433_v24  ;;  %2217 = vmatprep.mubr.msk.bf16.mxu1 %vm870_vm0, %v2435_v25 }
  0x3f   : > { %1023 = vmatmul.mubr.bf16.gmra.mrb[8].mxu0 %v2437_v26  ;;  %1151 = vmatmul.mubr.bf16.gmra.mrb[8].mxu1 %v2438_v27 }
  0x40   : > { %2202 = vmatprep.mubr.msk.bf16.mxu0 %vm870_vm0, %v2439_v28  ;;  %2218 = vmatprep.mubr.msk.bf16.mxu1 %vm870_vm0, %v2441_v29 }
  0x47   : > { %1031 = vmatmul.mubr.bf16.gmra.mrb[12].mxu0 %v2443_v30  ;;  %1159 = vmatmul.mubr.bf16.gmra.mrb[12].mxu1 %v2444_v31 }
  0x48   : > { %2203 = vmatprep.mubr.msk.bf16.mxu0 %vm870_vm0, %v2445_v32  ;;  %2219 = vmatprep.mubr.msk.bf16.mxu1 %vm870_vm0, %v2447_v33  ;;  %v380_v32 = vld [vmem:[#allocation2 + $0x10] sm:$0xff] }
  0x49   : > { %v412_v33 = vld [vmem:[#allocation2 + $0x110] sm:$0xff] }
  0x4f   : > { %1039 = vmatmul.mubr.bf16.gmra.mrb[16].mxu0 %v2449_v34  ;;  %1167 = vmatmul.mubr.bf16.gmra.mrb[16].mxu1 %v2450_v35  ;;  %v2882_v34 = vld [vmem:[%s3232_s2] ss:$0 sm:$0xff] }
  0x50   : > { %2204 = vmatprep.mubr.msk.bf16.mxu0 %vm870_vm0, %v2451_v36  ;;  %2220 = vmatprep.mubr.msk.bf16.mxu1 %vm870_vm0, %v2453_v37  ;;  %v381_v37 = vld [vmem:[#allocation2 + $0x18] sm:$0xff] }
  0x57   : > { %1047 = vmatmul.mubr.bf16.gmra.mrb[20].mxu0 %v2455_v38  ;;  %1175 = vmatmul.mubr.bf16.gmra.mrb[20].mxu1 %v2456_v39  ;;  %v413_v38 = vld [vmem:[#allocation2 + $0x118] sm:$0xff] }
  0x58   : > { %2205 = vmatprep.mubr.msk.bf16.mxu0 %vm870_vm0, %v2457_v40  ;;  %2221 = vmatprep.mubr.msk.bf16.mxu1 %vm870_vm0, %v2459_v41 }
  0x5f   : > { %1055 = vmatmul.mubr.bf16.gmra.mrb[24].mxu0 %v2461_v42  ;;  %1183 = vmatmul.mubr.bf16.gmra.mrb[24].mxu1 %v2462_v43 }
  0x60   : > { %2206 = vmatprep.mubr.msk.bf16.mxu0 %vm870_vm0, %v2463_v44  ;;  %2222 = vmatprep.mubr.msk.bf16.mxu1 %vm870_vm0, %v2465_v45  ;;  %v2887_v44 = vld [vmem:[%s3233_s3] ss:$0 sm:$0xff] }
  0x67   : > { %1063 = vmatmul.mubr.bf16.gmra.mrb[28].mxu0 %v2467_v46  ;;  %1191 = vmatmul.mubr.bf16.gmra.mrb[28].mxu1 %v2468_v47 }
  0x68   : > { %2207 = vmatprep.mubr.msk.bf16.mxu0 %vm870_vm0, %v2469_v48  ;;  %2223 = vmatprep.mubr.msk.bf16.mxu1 %vm870_vm0, %v2471_v49 }
  0x6f   : > { %1071 = vmatmul.mubr.bf16.gmra.mrb[32].mxu0 %v2473_v50  ;;  %1199 = vmatmul.mubr.bf16.gmra.mrb[32].mxu1 %v2474_v51 }
  0x70   : > { %2208 = vmatprep.mubr.msk.bf16.mxu0 %vm870_vm0, %v2475_v52  ;;  %2224 = vmatprep.mubr.msk.bf16.mxu1 %vm870_vm0, %v2477_v53 }
  0x77   : > { %1079 = vmatmul.mubr.bf16.gmra.mrb[36].mxu0 %v2479_v54  ;;  %1207 = vmatmul.mubr.bf16.gmra.mrb[36].mxu1 %v2480_v55 }
  0x78   : > { %2209 = vmatprep.mubr.msk.bf16.mxu0 %vm870_vm0, %v2481_v56  ;;  %2225 = vmatprep.mubr.msk.bf16.mxu1 %vm870_vm0, %v2483_v57 }
  0x7f   : > { %1087 = vmatmul.mubr.bf16.gmra.mrb[40].mxu0 %v2485_v58  ;;  %1215 = vmatmul.mubr.bf16.gmra.mrb[40].mxu1 %v2486_v59 }
  0x80   : > { %2210 = vmatprep.mubr.msk.bf16.mxu0 %vm870_vm0, %v2487_v60  ;;  %2226 = vmatprep.mubr.msk.bf16.mxu1 %vm870_vm0, %v2489_v61 }
  0x87   : > { %1095 = vmatmul.mubr.bf16.gmra.mrb[44].mxu0 %v2491_v62  ;;  %1223 = vmatmul.mubr.bf16.gmra.mrb[44].mxu1 %v2492_v63 }
  0x88   : > { %2211 = vmatprep.mubr.msk.bf16.mxu0 %vm870_vm0, %v2493_v0  ;;  %2227 = vmatprep.mubr.msk.bf16.mxu1 %vm870_vm0, %v2495_v1  ;;  %v382_v0 = vld [vmem:[#allocation2 + $0x20] sm:$0xff] }
  0x89   : > { %v414_v1 = vld [vmem:[#allocation2 + $0x120] sm:$0xff] }
  0x8f   : > { %1103 = vmatmul.mubr.bf16.gmra.mrb[48].mxu0 %v2497_v2  ;;  %1231 = vmatmul.mubr.bf16.gmra.mrb[48].mxu1 %v2498_v3 }
  0x90   : > { %2212 = vmatprep.mubr.msk.bf16.mxu0 %vm870_vm0, %v2499_v4  ;;  %2228 = vmatprep.mubr.msk.bf16.mxu1 %vm870_vm0, %v2501_v5 }
  0x97   : > { %1111 = vmatmul.mubr.bf16.gmra.mrb[52].mxu0 %v2503_v6  ;;  %1239 = vmatmul.mubr.bf16.gmra.mrb[52].mxu1 %v2504_v7 }
  0x98   : > { %2213 = vmatprep.mubr.msk.bf16.mxu0 %vm870_vm0, %v2505_v8  ;;  %2229 = vmatprep.mubr.msk.bf16.mxu1 %vm870_vm0, %v2507_v9 }
  0x9f   : > { %1119 = vmatmul.mubr.bf16.gmra.mrb[56].mxu0 %v2509_v10  ;;  %1247 = vmatmul.mubr.bf16.gmra.mrb[56].mxu1 %v2510_v11  ;;  %v383_v10 = vld [vmem:[#allocation2 + $0x28] sm:$0xff] }
  0xa0   : > { %2214 = vmatprep.mubr.msk.bf16.mxu0 %vm870_vm0, %v2511_v12  ;;  %2230 = vmatprep.mubr.msk.bf16.mxu1 %vm870_vm0, %v2513_v13  ;;  %v415_v11 = vld [vmem:[#allocation2 + $0x128] sm:$0xff] }
  0xa7   : > { %1127 = vmatmul.mubr.bf16.gmra.mrb[60].mxu0 %v2515_v14  ;;  %1255 = vmatmul.mubr.bf16.gmra.mrb[60].mxu1 %v2516_v15 }
 0x102   : > { %v1008_v18 = vpop.f32.mrb[0].mxu0  ;;  %v1136_v19 = vpop.f32.mrb[0].mxu1 }
 0x103   : > { %v1263_v22 = vadd.f32 %v1008_v18, %v378_v16  ;;  %v1295_v23 = vadd.f32 %v1136_v19, %v410_v17  ;;  %v1010_v24 = vpop.f32.mrb[1].mxu0  ;;  %v1138_v25 = vpop.f32.mrb[1].mxu1 }
 0x104   : > { %v1011_v26 = vpop.f32.mrb[2].mxu0  ;;  %v1139_v27 = vpop.f32.mrb[2].mxu1 }
 0x105   : > { %1328 = vst.msk [vmem:[#allocation2] sm:$0xff] %vm313_vm3, %v1263_v22  ;;  %1360 = vst.msk [vmem:[#allocation2 + $0x100] sm:$0xff] %vm313_vm3, %v1295_v23  ;;  %v1264_v28 = vadd.f32 %v1011_v26, %v379_v20  ;;  %v1296_v29 = vadd.f32 %v1139_v27, %v411_v21  ;;  %v1013_v30 = vpop.f32.mrb[3].mxu0  ;;  %v1141_v31 = vpop.f32.mrb[3].mxu1 }
 0x107   : > { %1329 = vst.msk [vmem:[#allocation2 + $0x8] sm:$0xff] %vm313_vm3, %v1264_v28  ;;  %1361 = vst.msk [vmem:[#allocation2 + $0x108] sm:$0xff] %vm313_vm3, %v1296_v29 }
 0x10a   : > { %v1016_v35 = vpop.f32.mrb[4].mxu0  ;;  %v1144_v36 = vpop.f32.mrb[4].mxu1 }
 0x10b   : > { %v1265_v39 = vadd.f32 %v1016_v35, %v380_v32  ;;  %v1297_v40 = vadd.f32 %v1144_v36, %v412_v33  ;;  %v1018_v41 = vpop.f32.mrb[5].mxu0  ;;  %v1146_v42 = vpop.f32.mrb[5].mxu1 }
 0x10c   : > { %v1395_v43 = vld [vmem:[#allocation2] sm:$0xff]  ;;  %v1019_v46 = vpop.f32.mrb[6].mxu0  ;;  %v1147_v47 = vpop.f32.mrb[6].mxu1  ;;  %v385_v41 = vld [vmem:[#allocation2 + $0x38] sm:$0xff] }
 0x10d   : > { %v1427_v45 = vld [vmem:[#allocation2 + $0x100] sm:$0xff]  ;;  %v1466_v48 = vmul.f32 %v2882_v34, %v1395_v43  ;;  %1330 = vst.msk [vmem:[#allocation2 + $0x10] sm:$0xff] %vm313_vm3, %v1265_v39  ;;  %1362 = vst.msk [vmem:[#allocation2 + $0x110] sm:$0xff] %vm313_vm3, %v1297_v40  ;;  %v1266_v50 = vadd.f32 %v1019_v46, %v381_v37  ;;  %v1298_v51 = vadd.f32 %v1147_v47, %v413_v38  ;;  %v1021_v52 = vpop.f32.mrb[7].mxu0  ;;  %v1149_v53 = vpop.f32.mrb[7].mxu1  ;;  %v384_v37 = vld [vmem:[#allocation2 + $0x30] sm:$0xff] }
 0x10e   : > { %v1498_v49 = vmul.f32 %v2882_v34, %v1427_v45  ;;  %v1396_v54 = vld [vmem:[#allocation2 + $0x8] sm:$0xff]  ;;  %v416_v38 = vld [vmem:[#allocation2 + $0x130] sm:$0xff]  ;;  %v417_v42 = vld [vmem:[#allocation2 + $0x138] sm:$0xff] }
 0x10f   : > { %v1428_v55 = vld [vmem:[#allocation2 + $0x108] sm:$0xff]  ;;  %v1537_v56 = vadd.f32 %v2887_v44, %v1466_v48  ;;  %v1467_v58 = vmul.f32 %v2882_v34, %v1396_v54  ;;  %1331 = vst.msk [vmem:[#allocation2 + $0x18] sm:$0xff] %vm313_vm3, %v1266_v50  ;;  %1363 = vst.msk [vmem:[#allocation2 + $0x118] sm:$0xff] %vm313_vm3, %v1298_v51 }
 0x110   : > { %v1569_v57 = vadd.f32 %v2887_v44, %v1498_v49  ;;  %v1499_v59 = vmul.f32 %v2882_v34, %v1428_v55 }
 0x111   : > { %v1601_v60 = vmax.f32 %v1537_v56, 0.0  ;;  %v1538_v62 = vadd.f32 %v2887_v44, %v1467_v58 }
 0x112   : > { %v1633_v61 = vmax.f32 %v1569_v57, 0.0  ;;  %v1570_v63 = vadd.f32 %v2887_v44, %v1499_v59  ;;  %v1024_v2 = vpop.f32.mrb[8].mxu0  ;;  %v1152_v3 = vpop.f32.mrb[8].mxu1 }
 0x113   : > { %v2300_v4 = vpack.c.bf16 %v1601_v60, %v1601_v60  ;;  %v1602_v6 = vmax.f32 %v1538_v62, 0.0  ;;  %v1026_v8 = vpop.f32.mrb[9].mxu0  ;;  %v1154_v9 = vpop.f32.mrb[9].mxu1  ;;  %v1267_v14 = vadd.f32 %v1024_v2, %v382_v0  ;;  %v1299_v15 = vadd.f32 %v1152_v3, %v414_v1 }
 0x114   : > { %v2332_v5 = vpack.c.bf16 %v1633_v61, %v1633_v61  ;;  %v1634_v7 = vmax.f32 %v1570_v63, 0.0  ;;  %v1397_v12 = vld [vmem:[#allocation2 + $0x10] sm:$0xff]  ;;  %v1027_v16 = vpop.f32.mrb[10].mxu0  ;;  %v1155_v17 = vpop.f32.mrb[10].mxu1 }
 0x115   : > { %v1429_v13 = vld [vmem:[#allocation2 + $0x110] sm:$0xff]  ;;  %1922 = vst.msk [vmem:[%s2905_s28] sm:$0xf] %vm1921_vm4, %v2300_v4  ;;  %v2301_v18 = vpack.c.bf16 %v1602_v6, %v1602_v6  ;;  %v1468_v20 = vmul.f32 %v2882_v34, %v1397_v12  ;;  %v1029_v22 = vpop.f32.mrb[11].mxu0  ;;  %v1157_v23 = vpop.f32.mrb[11].mxu1  ;;  %v1268_v26 = vadd.f32 %v1027_v16, %v383_v10  ;;  %v1300_v27 = vadd.f32 %v1155_v17, %v415_v11  ;;  %v386_v6 = vld [vmem:[#allocation2 + $0x40] sm:$0xff] }
 0x116   : > { %1954 = vst.msk [vmem:[%s2905_s28 + $0x80] sm:$0xf] %vm1921_vm4, %v2332_v5  ;;  %v2333_v19 = vpack.c.bf16 %v1634_v7, %v1634_v7  ;;  %v1500_v21 = vmul.f32 %v2882_v34, %v1429_v13  ;;  %v1398_v24 = vld [vmem:[#allocation2 + $0x18] sm:$0xff]  ;;  %v418_v7 = vld [vmem:[#allocation2 + $0x140] sm:$0xff] }
 0x117   : > { %v1430_v25 = vld [vmem:[#allocation2 + $0x118] sm:$0xff]  ;;  %1332 = vst.msk [vmem:[#allocation2 + $0x20] sm:$0xff] %vm313_vm3, %v1267_v14  ;;  %1364 = vst.msk [vmem:[#allocation2 + $0x120] sm:$0xff] %vm313_vm3, %v1299_v15  ;;  %v1539_v28 = vadd.f32 %v2887_v44, %v1468_v20  ;;  %v1469_v30 = vmul.f32 %v2882_v34, %v1398_v24  ;;  %v387_v14 = vld [vmem:[#allocation2 + $0x48] sm:$0xff] }
 0x118   : > { %1923 = vst.msk [vmem:[%s2905_s28 + $0x4] sm:$0xf] %vm1921_vm4, %v2301_v18  ;;  %1955 = vst.msk [vmem:[%s2905_s28 + $0x84] sm:$0xf] %vm1921_vm4, %v2333_v19  ;;  %v1571_v29 = vadd.f32 %v2887_v44, %v1500_v21  ;;  %v1501_v31 = vmul.f32 %v2882_v34, %v1430_v25  ;;  %v419_v15 = vld [vmem:[#allocation2 + $0x148] sm:$0xff] }
 0x119   : > { %1333 = vst.msk [vmem:[#allocation2 + $0x28] sm:$0xff] %vm313_vm3, %v1268_v26  ;;  %1365 = vst.msk [vmem:[#allocation2 + $0x128] sm:$0xff] %vm313_vm3, %v1300_v27  ;;  %v1603_v32 = vmax.f32 %v1539_v28, 0.0  ;;  %v1540_v35 = vadd.f32 %v2887_v44, %v1469_v30 }
 0x11a   : > { %v1635_v33 = vmax.f32 %v1571_v29, 0.0  ;;  %v1572_v36 = vadd.f32 %v2887_v44, %v1501_v31  ;;  %v1032_v39 = vpop.f32.mrb[12].mxu0  ;;  %v1160_v40 = vpop.f32.mrb[12].mxu1 }
 0x11b   : > { %v2302_v43 = vpack.c.bf16 %v1603_v32, %v1603_v32  ;;  %v1604_v46 = vmax.f32 %v1540_v35, 0.0  ;;  %v1034_v48 = vpop.f32.mrb[13].mxu0  ;;  %v1162_v49 = vpop.f32.mrb[13].mxu1  ;;  %v1269_v50 = vadd.f32 %v1032_v39, %v384_v37  ;;  %v1301_v51 = vadd.f32 %v1160_v40, %v416_v38 }
 0x11c   : > { %v2334_v45 = vpack.c.bf16 %v1635_v33, %v1635_v33  ;;  %v1636_v47 = vmax.f32 %v1572_v36, 0.0  ;;  %v1035_v52 = vpop.f32.mrb[14].mxu0  ;;  %v1163_v53 = vpop.f32.mrb[14].mxu1 }
 0x11d   : > { %1924 = vst.msk [vmem:[%s2905_s28 + $0x8] sm:$0xf] %vm1921_vm4, %v2302_v43  ;;  %v2303_v54 = vpack.c.bf16 %v1604_v46, %v1604_v46  ;;  %v1270_v58 = vadd.f32 %v1035_v52, %v385_v41  ;;  %v1302_v59 = vadd.f32 %v1163_v53, %v417_v42  ;;  %v1037_v60 = vpop.f32.mrb[15].mxu0  ;;  %v1165_v61 = vpop.f32.mrb[15].mxu1  ;;  %v388_v43 = vld [vmem:[#allocation2 + $0x50] sm:$0xff] }
 0x11e   : > { %1956 = vst.msk [vmem:[%s2905_s28 + $0x88] sm:$0xf] %vm1921_vm4, %v2334_v45  ;;  %v2335_v55 = vpack.c.bf16 %v1636_v47, %v1636_v47  ;;  %v1399_v56 = vld [vmem:[#allocation2 + $0x20] sm:$0xff]  ;;  %v420_v45 = vld [vmem:[#allocation2 + $0x150] sm:$0xff] }
 0x11f   : > { %v1431_v57 = vld [vmem:[#allocation2 + $0x120] sm:$0xff]  ;;  %v1470_v62 = vmul.f32 %v2882_v34, %v1399_v56  ;;  %1334 = vst.msk [vmem:[#allocation2 + $0x30] sm:$0xff] %vm313_vm3, %v1269_v50  ;;  %1366 = vst.msk [vmem:[#allocation2 + $0x130] sm:$0xff] %vm313_vm3, %v1301_v51 }
 0x120   : > { %v1502_v63 = vmul.f32 %v2882_v34, %v1431_v57  ;;  %1925 = vst.msk [vmem:[%s2905_s28 + $0xc] sm:$0xf] %vm1921_vm4, %v2303_v54  ;;  %1957 = vst.msk [vmem:[%s2905_s28 + $0x8c] sm:$0xf] %vm1921_vm4, %v2335_v55  ;;  %v1400_v0 = vld [vmem:[#allocation2 + $0x28] sm:$0xff] }
 0x121   : > { %v1432_v1 = vld [vmem:[#allocation2 + $0x128] sm:$0xff]  ;;  %1335 = vst.msk [vmem:[#allocation2 + $0x38] sm:$0xff] %vm313_vm3, %v1270_v58  ;;  %1367 = vst.msk [vmem:[#allocation2 + $0x138] sm:$0xff] %vm313_vm3, %v1302_v59  ;;  %v1541_v2 = vadd.f32 %v2887_v44, %v1470_v62  ;;  %v1471_v4 = vmul.f32 %v2882_v34, %v1400_v0  ;;  %v389_v58 = vld [vmem:[#allocation2 + $0x58] sm:$0xff] }
 0x122   : > { %v1573_v3 = vadd.f32 %v2887_v44, %v1502_v63  ;;  %v1503_v5 = vmul.f32 %v2882_v34, %v1432_v1  ;;  %v1040_v12 = vpop.f32.mrb[16].mxu0  ;;  %v1168_v13 = vpop.f32.mrb[16].mxu1  ;;  %v421_v59 = vld [vmem:[#allocation2 + $0x158] sm:$0xff] }
 0x123   : > { %v1605_v8 = vmax.f32 %v1541_v2, 0.0  ;;  %v1542_v10 = vadd.f32 %v2887_v44, %v1471_v4  ;;  %v1271_v16 = vadd.f32 %v1040_v12, %v386_v6  ;;  %v1303_v17 = vadd.f32 %v1168_v13, %v418_v7  ;;  %v1042_v18 = vpop.f32.mrb[17].mxu0  ;;  %v1170_v19 = vpop.f32.mrb[17].mxu1 }
 0x124   : > { %v1637_v9 = vmax.f32 %v1573_v3, 0.0  ;;  %v1574_v11 = vadd.f32 %v2887_v44, %v1503_v5  ;;  %v1043_v24 = vpop.f32.mrb[18].mxu0  ;;  %v1171_v25 = vpop.f32.mrb[18].mxu1 }
 0x125   : > { %v2304_v20 = vpack.c.bf16 %v1605_v8, %v1605_v8  ;;  %v1606_v22 = vmax.f32 %v1542_v10, 0.0  ;;  %1336 = vst.msk [vmem:[#allocation2 + $0x40] sm:$0xff] %vm313_vm3, %v1271_v16  ;;  %1368 = vst.msk [vmem:[#allocation2 + $0x140] sm:$0xff] %vm313_vm3, %v1303_v17  ;;  %v1272_v28 = vadd.f32 %v1043_v24, %v387_v14  ;;  %v1304_v29 = vadd.f32 %v1171_v25, %v419_v15  ;;  %v1045_v30 = vpop.f32.mrb[19].mxu0  ;;  %v1173_v31 = vpop.f32.mrb[19].mxu1 }
 0x126   : > { %v2336_v21 = vpack.c.bf16 %v1637_v9, %v1637_v9  ;;  %v1638_v23 = vmax.f32 %v1574_v11, 0.0  ;;  %v1401_v26 = vld [vmem:[#allocation2 + $0x30] sm:$0xff]  ;;  %v391_v30 = vld [vmem:[#allocation2 + $0x68] sm:$0xff] }
 0x127   : > { %v1433_v27 = vld [vmem:[#allocation2 + $0x130] sm:$0xff]  ;;  %1926 = vst.msk [vmem:[%s2905_s28 + $0x10] sm:$0xf] %vm1921_vm4, %v2304_v20  ;;  %v2305_v32 = vpack.c.bf16 %v1606_v22, %v1606_v22  ;;  %v1472_v35 = vmul.f32 %v2882_v34, %v1401_v26  ;;  %v390_v20 = vld [vmem:[#allocation2 + $0x60] sm:$0xff]  ;;  %v423_v31 = vld [vmem:[#allocation2 + $0x168] sm:$0xff] }
 0x128   : > { %1958 = vst.msk [vmem:[%s2905_s28 + $0x90] sm:$0xf] %vm1921_vm4, %v2336_v21  ;;  %v2337_v33 = vpack.c.bf16 %v1638_v23, %v1638_v23  ;;  %v1504_v36 = vmul.f32 %v2882_v34, %v1433_v27  ;;  %v1402_v37 = vld [vmem:[#allocation2 + $0x38] sm:$0xff]  ;;  %v422_v21 = vld [vmem:[#allocation2 + $0x160] sm:$0xff] }
 0x129   : > { %v1434_v38 = vld [vmem:[#allocation2 + $0x138] sm:$0xff]  ;;  %v1473_v39 = vmul.f32 %v2882_v34, %v1402_v37  ;;  %1337 = vst.msk [vmem:[#allocation2 + $0x48] sm:$0xff] %vm313_vm3, %v1272_v28  ;;  %1369 = vst.msk [vmem:[#allocation2 + $0x148] sm:$0xff] %vm313_vm3, %v1304_v29  ;;  %v1543_v41 = vadd.f32 %v2887_v44, %v1472_v35 }
 0x12a   : > { %v1505_v40 = vmul.f32 %v2882_v34, %v1434_v38  ;;  %1927 = vst.msk [vmem:[%s2905_s28 + $0x14] sm:$0xf] %vm1921_vm4, %v2305_v32  ;;  %1959 = vst.msk [vmem:[%s2905_s28 + $0x94] sm:$0xf] %vm1921_vm4, %v2337_v33  ;;  %v1575_v42 = vadd.f32 %v2887_v44, %v1504_v36  ;;  %v1048_v50 = vpop.f32.mrb[20].mxu0  ;;  %v1176_v51 = vpop.f32.mrb[20].mxu1 }
 0x12b   : > { %v1544_v46 = vadd.f32 %v2887_v44, %v1473_v39  ;;  %v1607_v48 = vmax.f32 %v1543_v41, 0.0  ;;  %v1273_v54 = vadd.f32 %v1048_v50, %v388_v43  ;;  %v1305_v55 = vadd.f32 %v1176_v51, %v420_v45  ;;  %v1050_v56 = vpop.f32.mrb[21].mxu0  ;;  %v1178_v57 = vpop.f32.mrb[21].mxu1 }
 0x12c   : > { %v1576_v47 = vadd.f32 %v2887_v44, %v1505_v40  ;;  %v1639_v49 = vmax.f32 %v1575_v42, 0.0  ;;  %v1403_v62 = vld [vmem:[#allocation2 + $0x40] sm:$0xff]  ;;  %v1051_v0 = vpop.f32.mrb[22].mxu0  ;;  %v1179_v1 = vpop.f32.mrb[22].mxu1 }
 0x12d   : > { %v1608_v52 = vmax.f32 %v1544_v46, 0.0  ;;  %v2306_v60 = vpack.c.bf16 %v1607_v48, %v1607_v48  ;;  %v1435_v63 = vld [vmem:[#allocation2 + $0x140] sm:$0xff]  ;;  %v1474_v4 = vmul.f32 %v2882_v34, %v1403_v62  ;;  %1338 = vst.msk [vmem:[#allocation2 + $0x50] sm:$0xff] %vm313_vm3, %v1273_v54  ;;  %1370 = vst.msk [vmem:[#allocation2 + $0x150] sm:$0xff] %vm313_vm3, %v1305_v55  ;;  %v1053_v6 = vpop.f32.mrb[23].mxu0  ;;  %v1181_v7 = vpop.f32.mrb[23].mxu1  ;;  %v1274_v10 = vadd.f32 %v1051_v0, %v389_v58 }
 0x12e   : > { %v1640_v53 = vmax.f32 %v1576_v47, 0.0  ;;  %v2338_v61 = vpack.c.bf16 %v1639_v49, %v1639_v49  ;;  %v1506_v5 = vmul.f32 %v2882_v34, %v1435_v63  ;;  %v1306_v11 = vadd.f32 %v1179_v1, %v421_v59  ;;  %v392_v54 = vld [vmem:[#allocation2 + $0x70] sm:$0xff]  ;;  %v393_v62 = vld [vmem:[#allocation2 + $0x78] sm:$0xff] }
 0x12f   : > { %v2307_v2 = vpack.c.bf16 %v1608_v52, %v1608_v52  ;;  %1928 = vst.msk [vmem:[%s2905_s28 + $0x18] sm:$0xf] %vm1921_vm4, %v2306_v60  ;;  %v1545_v12 = vadd.f32 %v2887_v44, %v1474_v4  ;;  %v424_v55 = vld [vmem:[#allocation2 + $0x170] sm:$0xff]  ;;  %v425_v63 = vld [vmem:[#allocation2 + $0x178] sm:$0xff] }
 0x130   : > { %v2339_v3 = vpack.c.bf16 %v1640_v53, %v1640_v53  ;;  %1960 = vst.msk [vmem:[%s2905_s28 + $0x98] sm:$0xf] %vm1921_vm4, %v2338_v61  ;;  %v1404_v8 = vld [vmem:[#allocation2 + $0x48] sm:$0xff]  ;;  %v1577_v13 = vadd.f32 %v2887_v44, %v1506_v5 }
 0x131   : > { %v1436_v9 = vld [vmem:[#allocation2 + $0x148] sm:$0xff]  ;;  %1929 = vst.msk [vmem:[%s2905_s28 + $0x1c] sm:$0xf] %vm1921_vm4, %v2307_v2  ;;  %v1475_v14 = vmul.f32 %v2882_v34, %v1404_v8  ;;  %v1609_v16 = vmax.f32 %v1545_v12, 0.0 }
 0x132   : > { %1961 = vst.msk [vmem:[%s2905_s28 + $0x9c] sm:$0xf] %vm1921_vm4, %v2339_v3  ;;  %v1507_v15 = vmul.f32 %v2882_v34, %v1436_v9  ;;  %v1641_v17 = vmax.f32 %v1577_v13, 0.0  ;;  %v1056_v22 = vpop.f32.mrb[24].mxu0  ;;  %v1184_v23 = vpop.f32.mrb[24].mxu1 }
 0x133   : > { %1339 = vst.msk [vmem:[#allocation2 + $0x58] sm:$0xff] %vm313_vm3, %v1274_v10  ;;  %1371 = vst.msk [vmem:[#allocation2 + $0x158] sm:$0xff] %vm313_vm3, %v1306_v11  ;;  %v1546_v18 = vadd.f32 %v2887_v44, %v1475_v14  ;;  %v2308_v24 = vpack.c.bf16 %v1609_v16, %v1609_v16  ;;  %v1058_v28 = vpop.f32.mrb[25].mxu0  ;;  %v1186_v29 = vpop.f32.mrb[25].mxu1  ;;  %v1275_v35 = vadd.f32 %v1056_v22, %v390_v20 }
 0x134   : > { %v1578_v19 = vadd.f32 %v2887_v44, %v1507_v15  ;;  %v2340_v25 = vpack.c.bf16 %v1641_v17, %v1641_v17  ;;  %v1405_v32 = vld [vmem:[#allocation2 + $0x50] sm:$0xff]  ;;  %v1307_v36 = vadd.f32 %v1184_v23, %v422_v21  ;;  %v1059_v37 = vpop.f32.mrb[26].mxu0  ;;  %v1187_v38 = vpop.f32.mrb[26].mxu1 }
 0x135   : > { %v1610_v26 = vmax.f32 %v1546_v18, 0.0  ;;  %v1437_v33 = vld [vmem:[#allocation2 + $0x150] sm:$0xff]  ;;  %1930 = vst.msk [vmem:[%s2905_s28 + $0x20] sm:$0xf] %vm1921_vm4, %v2308_v24  ;;  %v1476_v41 = vmul.f32 %v2882_v34, %v1405_v32  ;;  %v1061_v43 = vpop.f32.mrb[27].mxu0  ;;  %v1189_v45 = vpop.f32.mrb[27].mxu1  ;;  %v1276_v46 = vadd.f32 %v1059_v37, %v391_v30  ;;  %v1308_v47 = vadd.f32 %v1187_v38, %v423_v31 }
 0x136   : > { %v1642_v27 = vmax.f32 %v1578_v19, 0.0  ;;  %1962 = vst.msk [vmem:[%s2905_s28 + $0xa0] sm:$0xf] %vm1921_vm4, %v2340_v25  ;;  %v1508_v42 = vmul.f32 %v2882_v34, %v1437_v33 }
 0x137   : > { %v2309_v39 = vpack.c.bf16 %v1610_v26, %v1610_v26  ;;  %1340 = vst.msk [vmem:[#allocation2 + $0x60] sm:$0xff] %vm313_vm3, %v1275_v35  ;;  %1372 = vst.msk [vmem:[#allocation2 + $0x160] sm:$0xff] %vm313_vm3, %v1307_v36  ;;  %v1547_v48 = vadd.f32 %v2887_v44, %v1476_v41  ;;  %v394_v26 = vld [vmem:[#allocation2 + $0x80] sm:$0xff]  ;;  %v395_v35 = vld [vmem:[#allocation2 + $0x88] sm:$0xff] }
 0x138   : > { %v2341_v40 = vpack.c.bf16 %v1642_v27, %v1642_v27  ;;  %v1579_v49 = vadd.f32 %v2887_v44, %v1508_v42  ;;  %1341 = vst.msk [vmem:[#allocation2 + $0x68] sm:$0xff] %vm313_vm3, %v1276_v46  ;;  %1373 = vst.msk [vmem:[#allocation2 + $0x168] sm:$0xff] %vm313_vm3, %v1308_v47  ;;  %v426_v27 = vld [vmem:[#allocation2 + $0x180] sm:$0xff]  ;;  %v427_v36 = vld [vmem:[#allocation2 + $0x188] sm:$0xff] }
 0x139   : > { %1931 = vst.msk [vmem:[%s2905_s28 + $0x24] sm:$0xf] %vm1921_vm4, %v2309_v39  ;;  %v1611_v56 = vmax.f32 %v1547_v48, 0.0 }
 0x13a   : > { %1963 = vst.msk [vmem:[%s2905_s28 + $0xa4] sm:$0xf] %vm1921_vm4, %v2341_v40  ;;  %v1406_v50 = vld [vmem:[#allocation2 + $0x58] sm:$0xff]  ;;  %v1643_v57 = vmax.f32 %v1579_v49, 0.0  ;;  %v1064_v60 = vpop.f32.mrb[28].mxu0  ;;  %v1192_v61 = vpop.f32.mrb[28].mxu1 }
 0x13b   : > { %v1438_v51 = vld [vmem:[#allocation2 + $0x158] sm:$0xff]  ;;  %v1477_v52 = vmul.f32 %v2882_v34, %v1406_v50  ;;  %v2310_v0 = vpack.c.bf16 %v1611_v56, %v1611_v56  ;;  %v1277_v2 = vadd.f32 %v1064_v60, %v392_v54  ;;  %v1309_v3 = vadd.f32 %v1192_v61, %v424_v55  ;;  %v1066_v4 = vpop.f32.mrb[29].mxu0  ;;  %v1194_v5 = vpop.f32.mrb[29].mxu1 }
 0x13c   : > { %v1509_v53 = vmul.f32 %v2882_v34, %v1438_v51  ;;  %v2342_v1 = vpack.c.bf16 %v1643_v57, %v1643_v57  ;;  %v1067_v8 = vpop.f32.mrb[30].mxu0  ;;  %v1195_v9 = vpop.f32.mrb[30].mxu1  ;;  %v396_v4 = vld [vmem:[#allocation2 + $0x90] sm:$0xff] }
 0x13d   : > { %v1548_v58 = vadd.f32 %v2887_v44, %v1477_v52  ;;  %1932 = vst.msk [vmem:[%s2905_s28 + $0x28] sm:$0xf] %vm1921_vm4, %v2310_v0  ;;  %v1278_v12 = vadd.f32 %v1067_v8, %v393_v62  ;;  %v1310_v13 = vadd.f32 %v1195_v9, %v425_v63  ;;  %v1069_v14 = vpop.f32.mrb[31].mxu0  ;;  %v1197_v15 = vpop.f32.mrb[31].mxu1  ;;  %v428_v5 = vld [vmem:[#allocation2 + $0x190] sm:$0xff] }
 0x13e   : > { %v1580_v59 = vadd.f32 %v2887_v44, %v1509_v53  ;;  %1964 = vst.msk [vmem:[%s2905_s28 + $0xa8] sm:$0xf] %vm1921_vm4, %v2342_v1  ;;  %v1407_v10 = vld [vmem:[#allocation2 + $0x60] sm:$0xff]  ;;  %v397_v14 = vld [vmem:[#allocation2 + $0x98] sm:$0xff] }
 0x13f   : > { %v1612_v6 = vmax.f32 %v1548_v58, 0.0  ;;  %v1439_v11 = vld [vmem:[#allocation2 + $0x160] sm:$0xff]  ;;  %1342 = vst.msk [vmem:[#allocation2 + $0x70] sm:$0xff] %vm313_vm3, %v1277_v2  ;;  %1374 = vst.msk [vmem:[#allocation2 + $0x170] sm:$0xff] %vm313_vm3, %v1309_v3  ;;  %v1478_v18 = vmul.f32 %v2882_v34, %v1407_v10  ;;  %v1408_v20 = vld [vmem:[#allocation2 + $0x68] sm:$0xff] }
 0x140   : > { %v1644_v7 = vmax.f32 %v1580_v59, 0.0  ;;  %v1510_v19 = vmul.f32 %v2882_v34, %v1439_v11  ;;  %v1440_v21 = vld [vmem:[#allocation2 + $0x168] sm:$0xff]  ;;  %1343 = vst.msk [vmem:[#allocation2 + $0x78] sm:$0xff] %vm313_vm3, %v1278_v12  ;;  %1375 = vst.msk [vmem:[#allocation2 + $0x178] sm:$0xff] %vm313_vm3, %v1310_v13  ;;  %v1479_v24 = vmul.f32 %v2882_v34, %v1408_v20  ;;  %v429_v15 = vld [vmem:[#allocation2 + $0x198] sm:$0xff] }
 0x141   : > { %v2311_v16 = vpack.c.bf16 %v1612_v6, %v1612_v6  ;;  %v1549_v22 = vadd.f32 %v2887_v44, %v1478_v18  ;;  %v1511_v25 = vmul.f32 %v2882_v34, %v1440_v21 }
 0x142   : > { %v2343_v17 = vpack.c.bf16 %v1644_v7, %v1644_v7  ;;  %v1581_v23 = vadd.f32 %v2887_v44, %v1510_v19  ;;  %v1550_v30 = vadd.f32 %v2887_v44, %v1479_v24  ;;  %v1072_v32 = vpop.f32.mrb[32].mxu0  ;;  %v1200_v33 = vpop.f32.mrb[32].mxu1 }
 0x143   : > { %1933 = vst.msk [vmem:[%s2905_s28 + $0x2c] sm:$0xf] %vm1921_vm4, %v2311_v16  ;;  %v1613_v28 = vmax.f32 %v1549_v22, 0.0  ;;  %v1582_v31 = vadd.f32 %v2887_v44, %v1511_v25  ;;  %v1279_v37 = vadd.f32 %v1072_v32, %v394_v26  ;;  %v1311_v38 = vadd.f32 %v1200_v33, %v426_v27  ;;  %v1074_v39 = vpop.f32.mrb[33].mxu0  ;;  %v1202_v40 = vpop.f32.mrb[33].mxu1 }
 0x144   : > { %1965 = vst.msk [vmem:[%s2905_s28 + $0xac] sm:$0xf] %vm1921_vm4, %v2343_v17  ;;  %v1645_v29 = vmax.f32 %v1581_v23, 0.0  ;;  %v1614_v43 = vmax.f32 %v1550_v30, 0.0  ;;  %v1075_v48 = vpop.f32.mrb[34].mxu0  ;;  %v1203_v49 = vpop.f32.mrb[34].mxu1 }
 0x145   : > { %v2312_v41 = vpack.c.bf16 %v1613_v28, %v1613_v28  ;;  %v1646_v45 = vmax.f32 %v1582_v31, 0.0  ;;  %1344 = vst.msk [vmem:[#allocation2 + $0x80] sm:$0xff] %vm313_vm3, %v1279_v37  ;;  %1376 = vst.msk [vmem:[#allocation2 + $0x180] sm:$0xff] %vm313_vm3, %v1311_v38  ;;  %v1280_v52 = vadd.f32 %v1075_v48, %v395_v35  ;;  %v1312_v53 = vadd.f32 %v1203_v49, %v427_v36  ;;  %v1077_v54 = vpop.f32.mrb[35].mxu0  ;;  %v1205_v55 = vpop.f32.mrb[35].mxu1 }
 0x146   : > { %v2344_v42 = vpack.c.bf16 %v1645_v29, %v1645_v29  ;;  %v1409_v46 = vld [vmem:[#allocation2 + $0x70] sm:$0xff]  ;;  %v2313_v56 = vpack.c.bf16 %v1614_v43, %v1614_v43 }
 0x147   : > { %v1441_v47 = vld [vmem:[#allocation2 + $0x170] sm:$0xff]  ;;  %v1480_v50 = vmul.f32 %v2882_v34, %v1409_v46  ;;  %1934 = vst.msk [vmem:[%s2905_s28 + $0x30] sm:$0xf] %vm1921_vm4, %v2312_v41  ;;  %v2345_v57 = vpack.c.bf16 %v1646_v45, %v1646_v45  ;;  %v1410_v58 = vld [vmem:[#allocation2 + $0x78] sm:$0xff]  ;;  %v398_v41 = vld [vmem:[#allocation2 + $0xa0] sm:$0xff] }
 0x148   : > { %v1512_v51 = vmul.f32 %v2882_v34, %v1441_v47  ;;  %1966 = vst.msk [vmem:[%s2905_s28 + $0xb0] sm:$0xf] %vm1921_vm4, %v2344_v42  ;;  %v1442_v59 = vld [vmem:[#allocation2 + $0x178] sm:$0xff]  ;;  %v1481_v62 = vmul.f32 %v2882_v34, %v1410_v58  ;;  %1935 = vst.msk [vmem:[%s2905_s28 + $0x34] sm:$0xf] %vm1921_vm4, %v2313_v56  ;;  %v430_v42 = vld [vmem:[#allocation2 + $0x1a0] sm:$0xff] }
 0x149   : > { %v1551_v60 = vadd.f32 %v2887_v44, %v1480_v50  ;;  %v1513_v63 = vmul.f32 %v2882_v34, %v1442_v59  ;;  %1345 = vst.msk [vmem:[#allocation2 + $0x88] sm:$0xff] %vm313_vm3, %v1280_v52  ;;  %1377 = vst.msk [vmem:[#allocation2 + $0x188] sm:$0xff] %vm313_vm3, %v1312_v53  ;;  %v399_v46 = vld [vmem:[#allocation2 + $0xa8] sm:$0xff] }
 0x14a   : > { %v1583_v61 = vadd.f32 %v2887_v44, %v1512_v51  ;;  %1967 = vst.msk [vmem:[%s2905_s28 + $0xb4] sm:$0xf] %vm1921_vm4, %v2345_v57  ;;  %v1552_v2 = vadd.f32 %v2887_v44, %v1481_v62  ;;  %v1080_v6 = vpop.f32.mrb[36].mxu0  ;;  %v1208_v7 = vpop.f32.mrb[36].mxu1  ;;  %v431_v47 = vld [vmem:[#allocation2 + $0x1a8] sm:$0xff] }
 0x14b   : > { %v1615_v0 = vmax.f32 %v1551_v60, 0.0  ;;  %v1584_v3 = vadd.f32 %v2887_v44, %v1513_v63  ;;  %v1082_v12 = vpop.f32.mrb[37].mxu0  ;;  %v1210_v13 = vpop.f32.mrb[37].mxu1  ;;  %v1281_v18 = vadd.f32 %v1080_v6, %v396_v4  ;;  %v1313_v19 = vadd.f32 %v1208_v7, %v428_v5 }
 0x14c   : > { %v1647_v1 = vmax.f32 %v1583_v61, 0.0  ;;  %v1616_v10 = vmax.f32 %v1552_v2, 0.0  ;;  %v1411_v16 = vld [vmem:[#allocation2 + $0x80] sm:$0xff]  ;;  %v1083_v20 = vpop.f32.mrb[38].mxu0  ;;  %v1211_v21 = vpop.f32.mrb[38].mxu1 }
 0x14d   : > { %v2314_v8 = vpack.c.bf16 %v1615_v0, %v1615_v0  ;;  %v1648_v11 = vmax.f32 %v1584_v3, 0.0  ;;  %v1443_v17 = vld [vmem:[#allocation2 + $0x180] sm:$0xff]  ;;  %v1482_v24 = vmul.f32 %v2882_v34, %v1411_v16  ;;  %v1085_v26 = vpop.f32.mrb[39].mxu0  ;;  %v1213_v27 = vpop.f32.mrb[39].mxu1  ;;  %1346 = vst.msk [vmem:[#allocation2 + $0x90] sm:$0xff] %vm313_vm3, %v1281_v18  ;;  %1378 = vst.msk [vmem:[#allocation2 + $0x190] sm:$0xff] %vm313_vm3, %v1313_v19  ;;  %v1282_v30 = vadd.f32 %v1083_v20, %v397_v14 }
 0x14e   : > { %v2346_v9 = vpack.c.bf16 %v1647_v1, %v1647_v1  ;;  %v2315_v22 = vpack.c.bf16 %v1616_v10, %v1616_v10  ;;  %v1514_v25 = vmul.f32 %v2882_v34, %v1443_v17  ;;  %v1314_v31 = vadd.f32 %v1211_v21, %v429_v15  ;;  %v400_v10 = vld [vmem:[#allocation2 + $0xb0] sm:$0xff]  ;;  %v401_v18 = vld [vmem:[#allocation2 + $0xb8] sm:$0xff] }
 0x14f   : > { %1936 = vst.msk [vmem:[%s2905_s28 + $0x38] sm:$0xf] %vm1921_vm4, %v2314_v8  ;;  %v2347_v23 = vpack.c.bf16 %v1648_v11, %v1648_v11  ;;  %v1553_v32 = vadd.f32 %v2887_v44, %v1482_v24  ;;  %v432_v11 = vld [vmem:[#allocation2 + $0x1b0] sm:$0xff]  ;;  %v433_v19 = vld [vmem:[#allocation2 + $0x1b8] sm:$0xff] }
 0x150   : > { %1968 = vst.msk [vmem:[%s2905_s28 + $0xb8] sm:$0xf] %vm1921_vm4, %v2346_v9  ;;  %v1412_v28 = vld [vmem:[#allocation2 + $0x88] sm:$0xff]  ;;  %1937 = vst.msk [vmem:[%s2905_s28 + $0x3c] sm:$0xf] %vm1921_vm4, %v2315_v22  ;;  %v1585_v33 = vadd.f32 %v2887_v44, %v1514_v25 }
 0x151   : > { %v1444_v29 = vld [vmem:[#allocation2 + $0x188] sm:$0xff]  ;;  %1969 = vst.msk [vmem:[%s2905_s28 + $0xbc] sm:$0xf] %vm1921_vm4, %v2347_v23  ;;  %v1483_v35 = vmul.f32 %v2882_v34, %v1412_v28  ;;  %v1617_v37 = vmax.f32 %v1553_v32, 0.0 }
 0x152   : > { %v1515_v36 = vmul.f32 %v2882_v34, %v1444_v29  ;;  %1347 = vst.msk [vmem:[#allocation2 + $0x98] sm:$0xff] %vm313_vm3, %v1282_v30  ;;  %1379 = vst.msk [vmem:[#allocation2 + $0x198] sm:$0xff] %vm313_vm3, %v1314_v31  ;;  %v1649_v38 = vmax.f32 %v1585_v33, 0.0  ;;  %v1088_v43 = vpop.f32.mrb[40].mxu0  ;;  %v1216_v45 = vpop.f32.mrb[40].mxu1 }
 0x153   : > { %v1554_v39 = vadd.f32 %v2887_v44, %v1483_v35  ;;  %v2316_v48 = vpack.c.bf16 %v1617_v37, %v1617_v37  ;;  %v1090_v52 = vpop.f32.mrb[41].mxu0  ;;  %v1218_v53 = vpop.f32.mrb[41].mxu1  ;;  %v1283_v54 = vadd.f32 %v1088_v43, %v398_v41  ;;  %v1315_v55 = vadd.f32 %v1216_v45, %v430_v42 }
 0x154   : > { %v1586_v40 = vadd.f32 %v2887_v44, %v1515_v36  ;;  %v2348_v49 = vpack.c.bf16 %v1649_v38, %v1649_v38  ;;  %v1091_v56 = vpop.f32.mrb[42].mxu0  ;;  %v1219_v57 = vpop.f32.mrb[42].mxu1  ;;  %v1413_v60 = vld [vmem:[#allocation2 + $0x90] sm:$0xff] }
 0x155   : > { %v1618_v50 = vmax.f32 %v1554_v39, 0.0  ;;  %1938 = vst.msk [vmem:[%s2905_s28 + $0x40] sm:$0xf] %vm1921_vm4, %v2316_v48  ;;  %v1445_v61 = vld [vmem:[#allocation2 + $0x190] sm:$0xff]  ;;  %v1284_v62 = vadd.f32 %v1091_v56, %v399_v46  ;;  %v1316_v63 = vadd.f32 %v1219_v57, %v431_v47  ;;  %v1093_v0 = vpop.f32.mrb[43].mxu0  ;;  %v1221_v1 = vpop.f32.mrb[43].mxu1  ;;  %v1484_v2 = vmul.f32 %v2882_v34, %v1413_v60 }
 0x156   : > { %v1650_v51 = vmax.f32 %v1586_v40, 0.0  ;;  %1970 = vst.msk [vmem:[%s2905_s28 + $0xc0] sm:$0xf] %vm1921_vm4, %v2348_v49  ;;  %v1516_v3 = vmul.f32 %v2882_v34, %v1445_v61  ;;  %v402_v48 = vld [vmem:[#allocation2 + $0xc0] sm:$0xff] }
 0x157   : > { %v2317_v58 = vpack.c.bf16 %v1618_v50, %v1618_v50  ;;  %1348 = vst.msk [vmem:[#allocation2 + $0xa0] sm:$0xff] %vm313_vm3, %v1283_v54  ;;  %1380 = vst.msk [vmem:[#allocation2 + $0x1a0] sm:$0xff] %vm313_vm3, %v1315_v55  ;;  %v1555_v6 = vadd.f32 %v2887_v44, %v1484_v2  ;;  %v434_v49 = vld [vmem:[#allocation2 + $0x1c0] sm:$0xff] }
 0x158   : > { %v2349_v59 = vpack.c.bf16 %v1650_v51, %v1650_v51  ;;  %1349 = vst.msk [vmem:[#allocation2 + $0xa8] sm:$0xff] %vm313_vm3, %v1284_v62  ;;  %1381 = vst.msk [vmem:[#allocation2 + $0x1a8] sm:$0xff] %vm313_vm3, %v1316_v63  ;;  %v1587_v7 = vadd.f32 %v2887_v44, %v1516_v3  ;;  %v403_v62 = vld [vmem:[#allocation2 + $0xc8] sm:$0xff] }
 0x159   : > { %1939 = vst.msk [vmem:[%s2905_s28 + $0x44] sm:$0xf] %vm1921_vm4, %v2317_v58  ;;  %v1414_v4 = vld [vmem:[#allocation2 + $0x98] sm:$0xff]  ;;  %v1619_v12 = vmax.f32 %v1555_v6, 0.0  ;;  %v435_v63 = vld [vmem:[#allocation2 + $0x1c8] sm:$0xff] }
 0x15a   : > { %1971 = vst.msk [vmem:[%s2905_s28 + $0xc4] sm:$0xf] %vm1921_vm4, %v2349_v59  ;;  %v1446_v5 = vld [vmem:[#allocation2 + $0x198] sm:$0xff]  ;;  %v1485_v8 = vmul.f32 %v2882_v34, %v1414_v4  ;;  %v1651_v13 = vmax.f32 %v1587_v7, 0.0  ;;  %v1096_v16 = vpop.f32.mrb[44].mxu0  ;;  %v1224_v17 = vpop.f32.mrb[44].mxu1 }
 0x15b   : > { %v1517_v9 = vmul.f32 %v2882_v34, %v1446_v5  ;;  %v1285_v20 = vadd.f32 %v1096_v16, %v400_v10  ;;  %v1317_v21 = vadd.f32 %v1224_v17, %v432_v11  ;;  %v1098_v22 = vpop.f32.mrb[45].mxu0  ;;  %v1226_v23 = vpop.f32.mrb[45].mxu1  ;;  %v2318_v24 = vpack.c.bf16 %v1619_v12, %v1619_v12  ;;  %v3124_v17 = vld [vmem:[%s3232_s2] ss:$0 sm:$0xff] }
 0x15c   : > { %v1556_v14 = vadd.f32 %v2887_v44, %v1485_v8  ;;  %v2350_v25 = vpack.c.bf16 %v1651_v13, %v1651_v13  ;;  %v1099_v28 = vpop.f32.mrb[46].mxu0  ;;  %v1227_v29 = vpop.f32.mrb[46].mxu1 }
 0x15d   : > { %v1588_v15 = vadd.f32 %v2887_v44, %v1517_v9  ;;  %1350 = vst.msk [vmem:[#allocation2 + $0xb0] sm:$0xff] %vm313_vm3, %v1285_v20  ;;  %1382 = vst.msk [vmem:[#allocation2 + $0x1b0] sm:$0xff] %vm313_vm3, %v1317_v21  ;;  %v1286_v32 = vadd.f32 %v1099_v28, %v401_v18  ;;  %v1318_v33 = vadd.f32 %v1227_v29, %v433_v19  ;;  %v1101_v35 = vpop.f32.mrb[47].mxu0  ;;  %v1229_v36 = vpop.f32.mrb[47].mxu1 }
 0x15e   : > { %v1620_v26 = vmax.f32 %v1556_v14, 0.0  ;;  %v1415_v30 = vld [vmem:[#allocation2 + $0xa0] sm:$0xff]  ;;  %1940 = vst.msk [vmem:[%s2905_s28 + $0x48] sm:$0xf] %vm1921_vm4, %v2318_v24  ;;  %1972 = vst.msk [vmem:[%s2905_s28 + $0xc8] sm:$0xf] %vm1921_vm4, %v2350_v25 }
 0x15f   : > { %v1652_v27 = vmax.f32 %v1588_v15, 0.0  ;;  %v1447_v31 = vld [vmem:[#allocation2 + $0x1a0] sm:$0xff]  ;;  %v1486_v39 = vmul.f32 %v2882_v34, %v1415_v30  ;;  %v1416_v41 = vld [vmem:[#allocation2 + $0xa8] sm:$0xff]  ;;  %1351 = vst.msk [vmem:[#allocation2 + $0xb8] sm:$0xff] %vm313_vm3, %v1286_v32  ;;  %1383 = vst.msk [vmem:[#allocation2 + $0x1b8] sm:$0xff] %vm313_vm3, %v1318_v33 }
 0x160   : > { %v2319_v37 = vpack.c.bf16 %v1620_v26, %v1620_v26  ;;  %v1518_v40 = vmul.f32 %v2882_v34, %v1447_v31  ;;  %v1448_v42 = vld [vmem:[#allocation2 + $0x1a8] sm:$0xff]  ;;  %v1487_v43 = vmul.f32 %v2882_v34, %v1416_v41  ;;  %v404_v24 = vld [vmem:[#allocation2 + $0xd0] sm:$0xff]  ;;  %v405_v35 = vld [vmem:[#allocation2 + $0xd8] sm:$0xff] }
 0x161   : > { %v2351_v38 = vpack.c.bf16 %v1652_v27, %v1652_v27  ;;  %v1519_v45 = vmul.f32 %v2882_v34, %v1448_v42  ;;  %v1557_v46 = vadd.f32 %v2887_v44, %v1486_v39  ;;  %v436_v25 = vld [vmem:[#allocation2 + $0x1d0] sm:$0xff]  ;;  %v437_v36 = vld [vmem:[#allocation2 + $0x1d8] sm:$0xff] }
 0x162   : > { %1941 = vst.msk [vmem:[%s2905_s28 + $0x4c] sm:$0xf] %vm1921_vm4, %v2319_v37  ;;  %v1589_v47 = vadd.f32 %v2887_v44, %v1518_v40  ;;  %v1558_v50 = vadd.f32 %v2887_v44, %v1487_v43  ;;  %v1104_v54 = vpop.f32.mrb[48].mxu0  ;;  %v1232_v55 = vpop.f32.mrb[48].mxu1 }
 0x163   : > { %1973 = vst.msk [vmem:[%s2905_s28 + $0xcc] sm:$0xf] %vm1921_vm4, %v2351_v38  ;;  %v1590_v51 = vadd.f32 %v2887_v44, %v1519_v45  ;;  %v1621_v52 = vmax.f32 %v1557_v46, 0.0  ;;  %v1287_v58 = vadd.f32 %v1104_v54, %v402_v48  ;;  %v1319_v59 = vadd.f32 %v1232_v55, %v434_v49  ;;  %v1106_v60 = vpop.f32.mrb[49].mxu0  ;;  %v1234_v61 = vpop.f32.mrb[49].mxu1 }
 0x164   : > { %v1653_v53 = vmax.f32 %v1589_v47, 0.0  ;;  %v1622_v56 = vmax.f32 %v1558_v50, 0.0  ;;  %v1417_v2 = vld [vmem:[#allocation2 + $0xb0] sm:$0xff]  ;;  %v1107_v4 = vpop.f32.mrb[50].mxu0  ;;  %v1235_v5 = vpop.f32.mrb[50].mxu1 }
 0x165   : > { %v1654_v57 = vmax.f32 %v1590_v51, 0.0  ;;  %v2320_v0 = vpack.c.bf16 %v1621_v52, %v1621_v52  ;;  %v1449_v3 = vld [vmem:[#allocation2 + $0x1b0] sm:$0xff]  ;;  %v1488_v8 = vmul.f32 %v2882_v34, %v1417_v2  ;;  %1352 = vst.msk [vmem:[#allocation2 + $0xc0] sm:$0xff] %vm313_vm3, %v1287_v58  ;;  %1384 = vst.msk [vmem:[#allocation2 + $0x1c0] sm:$0xff] %vm313_vm3, %v1319_v59  ;;  %v1109_v10 = vpop.f32.mrb[51].mxu0  ;;  %v1237_v11 = vpop.f32.mrb[51].mxu1  ;;  %v1288_v14 = vadd.f32 %v1107_v4, %v403_v62 }
 0x166   : > { %v2352_v1 = vpack.c.bf16 %v1653_v53, %v1653_v53  ;;  %v2321_v6 = vpack.c.bf16 %v1622_v56, %v1622_v56  ;;  %v1520_v9 = vmul.f32 %v2882_v34, %v1449_v3  ;;  %v1418_v12 = vld [vmem:[#allocation2 + $0xb8] sm:$0xff]  ;;  %v1320_v15 = vadd.f32 %v1235_v5, %v435_v63  ;;  %v3147_v51 = vld [vmem:[%s3233_s3] ss:$0 sm:$0xff]  ;;  %v407_v2 = vld [vmem:[#allocation2 + $0xe8] sm:$0xff] }
 0x167   : > { %v2353_v7 = vpack.c.bf16 %v1654_v57, %v1654_v57  ;;  %1942 = vst.msk [vmem:[%s2905_s28 + $0x50] sm:$0xf] %vm1921_vm4, %v2320_v0  ;;  %v1450_v13 = vld [vmem:[#allocation2 + $0x1b8] sm:$0xff]  ;;  %v1559_v34 = vadd.f32 %v2887_v44, %v1488_v8  ;;  %v1489_v18 = vmul.f32 %v3124_v17, %v1418_v12  ;;  %v406_v58 = vld [vmem:[#allocation2 + $0xe0] sm:$0xff]  ;;  %v439_v3 = vld [vmem:[#allocation2 + $0x1e8] sm:$0xff] }
 0x168   : > { %1974 = vst.msk [vmem:[%s2905_s28 + $0xd0] sm:$0xf] %vm1921_vm4, %v2352_v1  ;;  %1943 = vst.msk [vmem:[%s2905_s28 + $0x54] sm:$0xf] %vm1921_vm4, %v2321_v6  ;;  %v1591_v16 = vadd.f32 %v2887_v44, %v1520_v9  ;;  %v1521_v19 = vmul.f32 %v3124_v17, %v1450_v13  ;;  %v438_v59 = vld [vmem:[#allocation2 + $0x1e0] sm:$0xff] }
 0x169   : > { %1975 = vst.msk [vmem:[%s2905_s28 + $0xd4] sm:$0xf] %vm1921_vm4, %v2353_v7  ;;  %v1623_v20 = vmax.f32 %v1559_v34, 0.0  ;;  %v1560_v22 = vadd.f32 %v2887_v44, %v1489_v18 }
 0x16a   : > { %1353 = vst.msk [vmem:[#allocation2 + $0xc8] sm:$0xff] %vm313_vm3, %v1288_v14  ;;  %1385 = vst.msk [vmem:[#allocation2 + $0x1c8] sm:$0xff] %vm313_vm3, %v1320_v15  ;;  %v1655_v21 = vmax.f32 %v1591_v16, 0.0  ;;  %v1592_v23 = vadd.f32 %v2887_v44, %v1521_v19  ;;  %v1112_v26 = vpop.f32.mrb[52].mxu0  ;;  %v1240_v27 = vpop.f32.mrb[52].mxu1 }
 0x16b   : > { %v2322_v28 = vpack.c.bf16 %v1623_v20, %v1623_v20  ;;  %v1624_v30 = vmax.f32 %v1560_v22, 0.0  ;;  %v1114_v32 = vpop.f32.mrb[53].mxu0  ;;  %v1242_v33 = vpop.f32.mrb[53].mxu1  ;;  %v1289_v39 = vadd.f32 %v1112_v26, %v404_v24  ;;  %v1321_v40 = vadd.f32 %v1240_v27, %v436_v25 }
 0x16c   : > { %v2354_v29 = vpack.c.bf16 %v1655_v21, %v1655_v21  ;;  %v1656_v31 = vmax.f32 %v1592_v23, 0.0  ;;  %v1419_v37 = vld [vmem:[#allocation2 + $0xc0] sm:$0xff]  ;;  %v1115_v44 = vpop.f32.mrb[54].mxu0  ;;  %v1243_v41 = vpop.f32.mrb[54].mxu1 }
 0x16d   : > { %v1451_v38 = vld [vmem:[#allocation2 + $0x1c0] sm:$0xff]  ;;  %1944 = vst.msk [vmem:[%s2905_s28 + $0x58] sm:$0xf] %vm1921_vm4, %v2322_v28  ;;  %v2323_v42 = vpack.c.bf16 %v1624_v30, %v1624_v30  ;;  %v1490_v45 = vmul.f32 %v3124_v17, %v1419_v37  ;;  %v1117_v47 = vpop.f32.mrb[55].mxu0  ;;  %v1245_v48 = vpop.f32.mrb[55].mxu1  ;;  %v1290_v49 = vadd.f32 %v1115_v44, %v405_v35  ;;  %v1322_v50 = vadd.f32 %v1243_v41, %v437_v36  ;;  %v408_v30 = vld [vmem:[#allocation2 + $0xf0] sm:$0xff] }
 0x16e   : > { %1976 = vst.msk [vmem:[%s2905_s28 + $0xd8] sm:$0xf] %vm1921_vm4, %v2354_v29  ;;  %v2355_v43 = vpack.c.bf16 %v1656_v31, %v1656_v31  ;;  %v1522_v46 = vmul.f32 %v3124_v17, %v1451_v38  ;;  %v440_v31 = vld [vmem:[#allocation2 + $0x1f0] sm:$0xff] }
 0x16f   : > { %1354 = vst.msk [vmem:[#allocation2 + $0xd0] sm:$0xff] %vm313_vm3, %v1289_v39  ;;  %1386 = vst.msk [vmem:[#allocation2 + $0x1d0] sm:$0xff] %vm313_vm3, %v1321_v40  ;;  %v1561_v52 = vadd.f32 %v3147_v51, %v1490_v45  ;;  %v409_v39 = vld [vmem:[#allocation2 + $0xf8] sm:$0xff] }
 0x170   : > { %1945 = vst.msk [vmem:[%s2905_s28 + $0x5c] sm:$0xf] %vm1921_vm4, %v2323_v42  ;;  %1977 = vst.msk [vmem:[%s2905_s28 + $0xdc] sm:$0xf] %vm1921_vm4, %v2355_v43  ;;  %v1593_v53 = vadd.f32 %v3147_v51, %v1522_v46  ;;  %v441_v40 = vld [vmem:[#allocation2 + $0x1f8] sm:$0xff] }
 0x171   : > { %v1420_v54 = vld [vmem:[#allocation2 + $0xc8] sm:$0xff]  ;;  %1355 = vst.msk [vmem:[#allocation2 + $0xd8] sm:$0xff] %vm313_vm3, %v1290_v49  ;;  %1387 = vst.msk [vmem:[#allocation2 + $0x1d8] sm:$0xff] %vm313_vm3, %v1322_v50  ;;  %v1625_v60 = vmax.f32 %v1561_v52, 0.0 }
 0x172   : > { %v1452_v55 = vld [vmem:[#allocation2 + $0x1c8] sm:$0xff]  ;;  %v1491_v56 = vmul.f32 %v3124_v17, %v1420_v54  ;;  %v1657_v61 = vmax.f32 %v1593_v53, 0.0  ;;  %v1120_v0 = vpop.f32.mrb[56].mxu0  ;;  %v1248_v1 = vpop.f32.mrb[56].mxu1 }
 0x173   : > { %v1523_v57 = vmul.f32 %v3124_v17, %v1452_v55  ;;  %v2324_v4 = vpack.c.bf16 %v1625_v60, %v1625_v60  ;;  %v1291_v6 = vadd.f32 %v1120_v0, %v406_v58  ;;  %v1323_v7 = vadd.f32 %v1248_v1, %v438_v59  ;;  %v1122_v8 = vpop.f32.mrb[57].mxu0  ;;  %v1250_v9 = vpop.f32.mrb[57].mxu1 }
 0x174   : > { %v1562_v62 = vadd.f32 %v3147_v51, %v1491_v56  ;;  %v2356_v5 = vpack.c.bf16 %v1657_v61, %v1657_v61  ;;  %v1123_v12 = vpop.f32.mrb[58].mxu0  ;;  %v1251_v13 = vpop.f32.mrb[58].mxu1 }
 0x175   : > { %v1594_v63 = vadd.f32 %v3147_v51, %v1523_v57  ;;  %1946 = vst.msk [vmem:[%s2905_s28 + $0x60] sm:$0xf] %vm1921_vm4, %v2324_v4  ;;  %v1292_v34 = vadd.f32 %v1123_v12, %v407_v2  ;;  %v1324_v16 = vadd.f32 %v1251_v13, %v439_v3  ;;  %v1125_v18 = vpop.f32.mrb[59].mxu0  ;;  %v1253_v19 = vpop.f32.mrb[59].mxu1 }
 0x176   : > { %v1626_v10 = vmax.f32 %v1562_v62, 0.0  ;;  %1978 = vst.msk [vmem:[%s2905_s28 + $0xe0] sm:$0xf] %vm1921_vm4, %v2356_v5  ;;  %v1421_v14 = vld [vmem:[#allocation2 + $0xd0] sm:$0xff] }
 0x177   : > { %v1658_v11 = vmax.f32 %v1594_v63, 0.0  ;;  %v1453_v15 = vld [vmem:[#allocation2 + $0x1d0] sm:$0xff]  ;;  %1356 = vst.msk [vmem:[#allocation2 + $0xe0] sm:$0xff] %vm313_vm3, %v1291_v6  ;;  %1388 = vst.msk [vmem:[#allocation2 + $0x1e0] sm:$0xff] %vm313_vm3, %v1323_v7  ;;  %v1492_v22 = vmul.f32 %v3124_v17, %v1421_v14 }
 0x178   : > { %v2325_v20 = vpack.c.bf16 %v1626_v10, %v1626_v10  ;;  %v1524_v23 = vmul.f32 %v3124_v17, %v1453_v15  ;;  %v1422_v24 = vld [vmem:[#allocation2 + $0xd8] sm:$0xff]  ;;  %1357 = vst.msk [vmem:[#allocation2 + $0xe8] sm:$0xff] %vm313_vm3, %v1292_v34  ;;  %1389 = vst.msk [vmem:[#allocation2 + $0x1e8] sm:$0xff] %vm313_vm3, %v1324_v16 }
 0x179   : > { %v2357_v21 = vpack.c.bf16 %v1658_v11, %v1658_v11  ;;  %v1454_v25 = vld [vmem:[#allocation2 + $0x1d8] sm:$0xff]  ;;  %v1563_v26 = vadd.f32 %v3147_v51, %v1492_v22  ;;  %v1493_v28 = vmul.f32 %v3124_v17, %v1422_v24 }
 0x17a   : > { %1947 = vst.msk [vmem:[%s2905_s28 + $0x64] sm:$0xf] %vm1921_vm4, %v2325_v20  ;;  %v1595_v27 = vadd.f32 %v3147_v51, %v1524_v23  ;;  %v1525_v29 = vmul.f32 %v3124_v17, %v1454_v25  ;;  %v1128_v37 = vpop.f32.mrb[60].mxu0  ;;  %v1256_v38 = vpop.f32.mrb[60].mxu1 }
 0x17b   : > { %1979 = vst.msk [vmem:[%s2905_s28 + $0xe4] sm:$0xf] %vm1921_vm4, %v2357_v21  ;;  %v1627_v32 = vmax.f32 %v1563_v26, 0.0  ;;  %v1564_v35 = vadd.f32 %v3147_v51, %v1493_v28  ;;  %v1293_v44 = vadd.f32 %v1128_v37, %v408_v30  ;;  %v1325_v41 = vadd.f32 %v1256_v38, %v440_v31  ;;  %v1130_v42 = vpop.f32.mrb[61].mxu0  ;;  %v1258_v43 = vpop.f32.mrb[61].mxu1 }
 0x17c   : > { %v1659_v33 = vmax.f32 %v1595_v27, 0.0  ;;  %v1596_v36 = vadd.f32 %v3147_v51, %v1525_v29  ;;  %v1131_v52 = vpop.f32.mrb[62].mxu0  ;;  %v1259_v53 = vpop.f32.mrb[62].mxu1 }
 0x17d   : > { %v2326_v45 = vpack.c.bf16 %v1627_v32, %v1627_v32  ;;  %v1628_v47 = vmax.f32 %v1564_v35, 0.0  ;;  %1358 = vst.msk [vmem:[#allocation2 + $0xf0] sm:$0xff] %vm313_vm3, %v1293_v44  ;;  %1390 = vst.msk [vmem:[#allocation2 + $0x1f0] sm:$0xff] %vm313_vm3, %v1325_v41  ;;  %v1294_v56 = vadd.f32 %v1131_v52, %v409_v39  ;;  %v1326_v57 = vadd.f32 %v1259_v53, %v441_v40  ;;  %v1133_v58 = vpop.f32.mrb[63].mxu0  ;;  %v1261_v59 = vpop.f32.mrb[63].mxu1 }
 0x17e   : > { %v2358_v46 = vpack.c.bf16 %v1659_v33, %v1659_v33  ;;  %v1660_v48 = vmax.f32 %v1596_v36, 0.0  ;;  %v1423_v49 = vld [vmem:[#allocation2 + $0xe0] sm:$0xff] }
 0x17f   : > { %v1455_v50 = vld [vmem:[#allocation2 + $0x1e0] sm:$0xff]  ;;  %v1494_v54 = vmul.f32 %v3124_v17, %v1423_v49  ;;  %1948 = vst.msk [vmem:[%s2905_s28 + $0x68] sm:$0xf] %vm1921_vm4, %v2326_v45  ;;  %v2327_v60 = vpack.c.bf16 %v1628_v47, %v1628_v47  ;;  %v1424_v62 = vld [vmem:[#allocation2 + $0xe8] sm:$0xff] }
 0x180   : > { %v1526_v55 = vmul.f32 %v3124_v17, %v1455_v50  ;;  %1980 = vst.msk [vmem:[%s2905_s28 + $0xe8] sm:$0xf] %vm1921_vm4, %v2358_v46  ;;  %v2359_v61 = vpack.c.bf16 %v1660_v48, %v1660_v48  ;;  %v1456_v63 = vld [vmem:[#allocation2 + $0x1e8] sm:$0xff]  ;;  %v1495_v2 = vmul.f32 %v3124_v17, %v1424_v62 }
 0x181   : > { %v1565_v0 = vadd.f32 %v3147_v51, %v1494_v54  ;;  %v1527_v3 = vmul.f32 %v3124_v17, %v1456_v63  ;;  %1359 = vst.msk [vmem:[#allocation2 + $0xf8] sm:$0xff] %vm313_vm3, %v1294_v56  ;;  %1391 = vst.msk [vmem:[#allocation2 + $0x1f8] sm:$0xff] %vm313_vm3, %v1326_v57 }
 0x182   : > { %v1597_v1 = vadd.f32 %v3147_v51, %v1526_v55  ;;  %1949 = vst.msk [vmem:[%s2905_s28 + $0x6c] sm:$0xf] %vm1921_vm4, %v2327_v60  ;;  %1981 = vst.msk [vmem:[%s2905_s28 + $0xec] sm:$0xf] %vm1921_vm4, %v2359_v61  ;;  %v1566_v6 = vadd.f32 %v3147_v51, %v1495_v2 }
 0x183   : > { %v1629_v4 = vmax.f32 %v1565_v0, 0.0  ;;  %v1598_v7 = vadd.f32 %v3147_v51, %v1527_v3 }
 0x184   : > { %v1661_v5 = vmax.f32 %v1597_v1, 0.0  ;;  %v1630_v10 = vmax.f32 %v1566_v6, 0.0  ;;  %v1425_v12 = vld [vmem:[#allocation2 + $0xf0] sm:$0xff] }
 0x185   : > { %v2328_v8 = vpack.c.bf16 %v1629_v4, %v1629_v4  ;;  %v1662_v11 = vmax.f32 %v1598_v7, 0.0  ;;  %v1457_v13 = vld [vmem:[#allocation2 + $0x1f0] sm:$0xff]  ;;  %v1496_v34 = vmul.f32 %v3124_v17, %v1425_v12 }
 0x186   : > { %v2360_v9 = vpack.c.bf16 %v1661_v5, %v1661_v5  ;;  %v2329_v14 = vpack.c.bf16 %v1630_v10, %v1630_v10  ;;  %v1528_v16 = vmul.f32 %v3124_v17, %v1457_v13 }
 0x187   : > { %1950 = vst.msk [vmem:[%s2905_s28 + $0x70] sm:$0xf] %vm1921_vm4, %v2328_v8  ;;  %v2361_v15 = vpack.c.bf16 %v1662_v11, %v1662_v11  ;;  %v1567_v20 = vadd.f32 %v3147_v51, %v1496_v34 }
 0x188   : > { %1982 = vst.msk [vmem:[%s2905_s28 + $0xf0] sm:$0xf] %vm1921_vm4, %v2360_v9  ;;  %v1426_v18 = vld [vmem:[#allocation2 + $0xf8] sm:$0xff]  ;;  %1951 = vst.msk [vmem:[%s2905_s28 + $0x74] sm:$0xf] %vm1921_vm4, %v2329_v14  ;;  %v1599_v21 = vadd.f32 %v3147_v51, %v1528_v16 }
 0x189   : > { %v1458_v19 = vld [vmem:[#allocation2 + $0x1f8] sm:$0xff]  ;;  %1983 = vst.msk [vmem:[%s2905_s28 + $0xf4] sm:$0xf] %vm1921_vm4, %v2361_v15  ;;  %v1497_v22 = vmul.f32 %v3124_v17, %v1426_v18  ;;  %v1631_v24 = vmax.f32 %v1567_v20, 0.0 }
 0x18a   : > { %v1529_v23 = vmul.f32 %v3124_v17, %v1458_v19  ;;  %v1663_v25 = vmax.f32 %v1599_v21, 0.0 }
 0x18b   : > { %v1568_v26 = vadd.f32 %v3147_v51, %v1497_v22  ;;  %v2330_v28 = vpack.c.bf16 %v1631_v24, %v1631_v24 }
 0x18c   : > { %v1600_v27 = vadd.f32 %v3147_v51, %v1529_v23  ;;  %v2362_v29 = vpack.c.bf16 %v1663_v25, %v1663_v25 }
 0x18d   : > { %v1632_v30 = vmax.f32 %v1568_v26, 0.0  ;;  %1952 = vst.msk [vmem:[%s2905_s28 + $0x78] sm:$0xf] %vm1921_vm4, %v2330_v28 }
 0x18e   : > { %v1664_v31 = vmax.f32 %v1600_v27, 0.0  ;;  %1984 = vst.msk [vmem:[%s2905_s28 + $0xf8] sm:$0xf] %vm1921_vm4, %v2362_v29 }
 0x18f   : > { %v2331_v32 = vpack.c.bf16 %v1632_v30, %v1632_v30 }
 0x190   : > { %v2363_v33 = vpack.c.bf16 %v1664_v31, %v1664_v31 }
 0x191   : > { %1953 = vst.msk [vmem:[%s2905_s28 + $0x7c] sm:$0xf] %vm1921_vm4, %v2331_v32 }
 0x192   : > { %1985 = vst.msk [vmem:[%s2905_s28 + $0xfc] sm:$0xf] %vm1921_vm4, %v2363_v33 }
 0x193 PF: > { %s14_s17 = sadd.s32 1, %s2541_s17   ;;  %s3235_s15 = smov %s2537_s16 }
 0x194   : > { %p11_p5 = scmp.ge.s32.totalorder %s14_s17, 6   ;;  %s3236_s16 = smov %s3238_s18 }
 0x196   :  { %13 = sbr.rel (!%p11_p5) target bundleno = 2 (0x2), region = 83 }

</bundles_post_ra>
